<compile_context>
chip_gen: v7x
topology: tpu7x:2x2x1
jax: 0.10.0
libtpu: 0.0.40
codegen_flags: <defaults>
</compile_context>

<pallas_src>
import functools

import jax
import jax.numpy as jnp
import numpy as np
from jax.experimental import pallas as pl
from jax.experimental.pallas import tpu as pltpu

NUM_HEADS = 8
_NEG_INF = -1e30


def _round_up(a, b):
    return (a + b - 1) // b * b


def _cross_attention_kernel(x_ref, wq_ref, bq_ref, khT_ref, mbias_ref,
                            vwo_ref, bo_ref, out_ref, attn_ref,
                            q_sc, out_acc, attn_acc, *, num_heads, dp):
    h = pl.program_id(1)

    @pl.when(h == 0)
    def _init():
        # q projection once per row block; attention scale pre-folded into wq/bq.
        q = jnp.dot(x_ref[...], wq_ref[...],
                    preferred_element_type=jnp.float32) + bq_ref[...]
        q_sc[...] = q.astype(q_sc.dtype)
        out_acc[...] = jnp.zeros_like(out_acc)
        attn_acc[...] = jnp.zeros_like(attn_acc)

    # Per-head q: a free, 128-aligned lane slice of the head-major q scratch.
    start = pl.multiple_of(h * dp, dp)
    qh = q_sc[:, pl.ds(start, dp)]                                 # (TM, Dp) bf16

    # Per-head scores: (TM, Dp) @ (Dp, Mp); padded D rows / M cols are zero.
    s = jnp.dot(qh, khT_ref[0],
                preferred_element_type=jnp.float32) + mbias_ref[...]
    m = jnp.max(s, axis=-1, keepdims=True)
    e = jnp.exp(s - m)                                             # padded cols -> exactly 0
    denom = jnp.sum(e, axis=-1, keepdims=True)                     # >= 1 always
    inv = pl.reciprocal(denom, approx=True)                        # EUP slot
    inv = inv * (2.0 - denom * inv)                                # one Newton step
    p = e * inv

    attn_acc[...] += p
    # (attn @ V) @ Wout == attn @ (V @ Wout); V @ Wout is precomputed per head.
    out_acc[...] += jnp.dot(p.astype(vwo_ref.dtype), vwo_ref[0],
                            preferred_element_type=jnp.float32)

    @pl.when(h == num_heads - 1)
    def _finalize():
        out_ref[...] = (out_acc[...] + bo_ref[...]).astype(out_ref.dtype)
        attn_ref[...] = (attn_acc[...] * (1.0 / num_heads)).astype(attn_ref.dtype)


def precompute_constants(concepts, params, *, num_heads=NUM_HEADS,
                         mxu_dtype=jnp.bfloat16):
    """Batch-invariant precompute.  Cache the result across forward calls
    whenever `concepts` / `params` are static."""
    C = params["wq"].shape[0]
    n_out = params["wo"].shape[1]
    M = concepts.shape[0]
    H = num_heads
    assert C % H == 0, "dim must be divisible by num_heads"
    D = C // H
    scale = D ** (-0.5)
    f32 = jnp.float32

    Dp = _round_up(D, 128)                 # per-head lane-aligned contraction
    Mp = _round_up(max(M, 1), 128)         # lane-dense attention output
    Np = _round_up(max(n_out, 1), 128)     # lane-dense main output

    # Head-major, scale-folded q projection weights: head h owns lanes
    # [h*Dp, h*Dp + D); padded lanes are exactly zero.
    wq_hm = (params["wq"] * scale).reshape(C, H, D)
    wq_hm = jnp.pad(wq_hm, ((0, 0), (0, 0), (0, Dp - D))).reshape(C, H * Dp)
    bq_hm = (params["bq"][0] * scale).reshape(H, D)
    bq_hm = jnp.pad(bq_hm, ((0, 0), (0, Dp - D))).reshape(1, H * Dp)

    # TODO(synk): attention/projection dropout omitted (eval-mode identity).
    k = concepts @ params["wk"] + params["bk"][0]                  # (M, C)
    v = concepts @ params["wv"] + params["bv"][0]                  # (M, C)

    # Per-head K^T, zero-padded to (H, Dp, Mp).
    khT = k.reshape(M, H, D).transpose(1, 2, 0)                    # (H, D, M)
    khT = jnp.pad(khT, ((0, 0), (0, Dp - D), (0, Mp - M)))

    # Per-head V @ Wout, zero-padded to (H, Mp, Np): fuses the context merge
    # and the output projection into one per-head matmul inside the kernel.
    vh = v.reshape(M, H, D).transpose(1, 0, 2)                     # (H, M, D)
    wo3 = params["wo"].reshape(H, D, n_out)                        # (H, D, n_out)
    vwo = jnp.einsum("hmd,hdo->hmo", vh, wo3)
    vwo = jnp.pad(vwo, ((0, 0), (0, Mp - M), (0, Np - n_out)))

    mbias = jnp.where(jnp.arange(Mp)[None, :] < M, 0.0, _NEG_INF).astype(f32)
    bo_p = jnp.pad(params["bo"], ((0, 0), (0, Np - n_out))).astype(f32)

    return {
        "wq_hm": wq_hm.astype(mxu_dtype),
        "bq_hm": bq_hm.astype(f32),
        "khT": khT.astype(mxu_dtype),
        "mbias": mbias,
        "vwo": vwo.astype(mxu_dtype),
        "bo_p": bo_p,
        "dims": (H, D, Dp, M, Mp, n_out, Np, C),
        "mxu_dtype": mxu_dtype,
    }


def cross_attention(x, concepts, params, *, num_heads=NUM_HEADS, constants=None):
    B, N, C = x.shape
    if constants is None:
        constants = precompute_constants(concepts, params, num_heads=num_heads)
    H, D, Dp, M, Mp, n_out, Np, Cc = constants["dims"]
    assert Cc == C
    mxu_dtype = constants["mxu_dtype"]
    f32 = jnp.float32
    HDp = H * Dp

    # Row-flattened, padded x tiling: >= 2 row steps so v7x's 2 TensorCores
    # both get work; large tiles amortize the ~0.35 us/step grid overhead.
    R = B * N
    TM = min(512, max(8, _round_up(pl.cdiv(R, 2), 8)))
    Rp = _round_up(R, TM)
    xf = jnp.pad(x.reshape(R, C), ((0, Rp - R), (0, 0))).astype(mxu_dtype)

    kernel = functools.partial(_cross_attention_kernel, num_heads=H, dp=Dp)

    out_shape = (jax.ShapeDtypeStruct((Rp, Np), f32),
                 jax.ShapeDtypeStruct((Rp, Mp), jnp.bfloat16))

    # VMEM limit derived from the actual block sizes (double-buffered inputs
    # and outputs + scratch) with 1.5x headroom, capped for v7x (64 MiB phys).
    isz = jnp.dtype(mxu_dtype).itemsize
    est_vmem = (
        2 * (TM * C + C * HDp + Dp * Mp + Mp * Np) * isz        # mxu-dtype inputs
        + 2 * (HDp + Mp + Np) * 4                               # f32 bias / mask rows
        + 2 * (TM * Np * 4 + TM * Mp * 2)                       # outputs
        + TM * HDp * isz + TM * (Np + Mp) * 4)                  # scratch
    vmem_cap = 48 * 1024 * 1024
    try:
        vmem_cap = int(pltpu.get_tpu_info().vmem_capacity_bytes * 3 // 4)
    except Exception:
        pass
    vmem_limit = max(32 * 1024 * 1024, min(int(est_vmem * 3 // 2), vmem_cap))

    def build(single_buffer):
        def const_spec(shape):
            zero = (0,) * len(shape)
            idx = lambda i, h: zero
            if single_buffer:
                # Grid-invariant operand: double-buffering it is pure VMEM waste.
                return pl.BlockSpec(shape, idx, pipeline_mode=pl.Buffered(1))
            return pl.BlockSpec(shape, idx)

        grid_spec = pltpu.PrefetchScalarGridSpec(
            num_scalar_prefetch=0,
            grid=(Rp // TM, H),
            in_specs=[
                pl.BlockSpec((TM, C), lambda i, h: (i, 0)),         # x rows
                const_spec((C, HDp)),                               # head-major wq (scaled)
                const_spec((1, HDp)),                               # head-major bq (scaled)
                pl.BlockSpec((1, Dp, Mp), lambda i, h: (h, 0, 0)),  # per-head K^T
                const_spec((1, Mp)),                                # score pad mask
                pl.BlockSpec((1, Mp, Np), lambda i, h: (h, 0, 0)),  # per-head V @ Wout
                const_spec((1, Np)),                                # bo (padded)
            ],
            out_specs=[
                pl.BlockSpec((TM, Np), lambda i, h: (i, 0)),
                pl.BlockSpec((TM, Mp), lambda i, h: (i, 0)),
            ],
            scratch_shapes=[
                pltpu.VMEM((TM, HDp), mxu_dtype),                   # head-major q
                pltpu.VMEM((TM, Np), f32),                          # out accumulator
                pltpu.VMEM((TM, Mp), f32),                          # attn accumulator
            ],
        )
        return pl.pallas_call(
            kernel,
            out_shape=out_shape,
            grid_spec=grid_spec,
            compiler_params=pltpu.CompilerParams(
                dimension_semantics=("parallel", "arbitrary"),
                vmem_limit_bytes=vmem_limit),
        )

    args = (xf, constants["wq_hm"], constants["bq_hm"], constants["khT"],
            constants["mbias"], constants["vwo"], constants["bo_p"])
    try:
        out_p, attn_p = jax.block_until_ready(build(True)(*args))
    except Exception:
        # This jax version rejected pl.Buffered(1) single-buffering; fall back
        # to default double-buffered invariants (correctness unchanged).
        out_p, attn_p = jax.block_until_ready(build(False)(*args))

    out = out_p[:R, :n_out].reshape(B, N, n_out)
    attn_mean = attn_p[:R, :M].astype(f32).reshape(B, N, M)
    return out, attn_mean


def init_params(key, dim, n_outputs):
    """Deterministic PyTorch-Linear-style init; weights stored as (in, out)."""
    ks = jax.random.split(key, 8)
    bound = 1.0 / np.sqrt(dim)

    def u(k, shape, b):
        return jax.random.uniform(k, shape, jnp.float32, -b, b)

    return {
        "wq": u(ks[0], (dim, dim), bound), "bq": u(ks[1], (1, dim), bound),
        "wk": u(ks[2], (dim, dim), bound), "bk": u(ks[3], (1, dim), bound),
        "wv": u(ks[4], (dim, dim), bound), "bv": u(ks[5], (1, dim), bound),
        "wo": u(ks[6], (dim, n_outputs), bound), "bo": u(ks[7], (1, n_outputs), bound),
    }


def reference(x, concepts, params, *, num_heads=NUM_HEADS):
    """Pure-JAX reference matching the PyTorch forward (eval mode)."""
    B, N, C = x.shape
    D = C // num_heads
    scale = D ** (-0.5)
    q = x @ params["wq"] + params["bq"][0]
    k = concepts @ params["wk"] + params["bk"][0]
    v = concepts @ params["wv"] + params["bv"][0]
    q = q.reshape(B, N, num_heads, D).transpose(0, 2, 1, 3)        # (B,H,N,D)
    k = k.reshape(-1, num_heads, D).transpose(1, 0, 2)             # (H,M,D)
    v = v.reshape(-1, num_heads, D).transpose(1, 0, 2)             # (H,M,D)
    attn = jnp.einsum("bhnd,hmd->bhnm", q, k) * scale
    attn = jax.nn.softmax(attn, axis=-1)
    ctx = jnp.einsum("bhnm,hmd->bhnd", attn, v)
    ctx = ctx.transpose(0, 2, 1, 3).reshape(B, N, C)
    out = ctx @ params["wo"] + params["bo"][0]
    return out, attn.mean(axis=1)


if __name__ == "__main__":
    B, N, C = 2, 8, 32          # batch, seq, dim (dim // num_heads = 4)
    M = 8                       # number of concepts
    n_outputs = 16

    key = jax.random.PRNGKey(0)
    kx, kc, kp = jax.random.split(key, 3)
    x = jax.random.normal(kx, (B, N, C), jnp.float32)
    concepts = jax.random.normal(kc, (M, C), jnp.float32)
    params = init_params(kp, C, n_outputs)

    consts = precompute_constants(concepts, params)   # cacheable across calls
    out, attn_mean = cross_attention(x, concepts, params, constants=consts)
    out = jax.block_until_ready(out)
    attn_mean = jax.block_until_ready(attn_mean)

    ref_out, ref_attn = reference(x, concepts, params)
    assert out.shape == (B, N, n_outputs) and attn_mean.shape == (B, N, M)
    # bf16 MXU operands with f32 accumulation -> bf16-level tolerance.
    np.testing.assert_allclose(np.asarray(out), np.asarray(ref_out),
                               rtol=2e-2, atol=2e-2)
    np.testing.assert_allclose(np.asarray(attn_mean), np.asarray(ref_attn),
                               rtol=2e-2, atol=2e-2)
    print("KERNEL_OK")
</pallas_src>

<mosaic_0001>
module attributes {stable_mosaic.version = 11 : i64} {
  func.func @_cross_attention_kernel(%arg0: i32, %arg1: i32, %arg2: memref<8x32xbf16, #tpu.memory_space<vmem>>, %arg3: memref<32x1024xbf16, #tpu.memory_space<vmem>>, %arg4: memref<1x1024xf32, #tpu.memory_space<vmem>>, %arg5: memref<1x128x128xbf16, #tpu.memory_space<vmem>>, %arg6: memref<1x128xf32, #tpu.memory_space<vmem>>, %arg7: memref<1x128x128xbf16, #tpu.memory_space<vmem>>, %arg8: memref<1x128xf32, #tpu.memory_space<vmem>>, %arg9: memref<8x128xf32, #tpu.memory_space<vmem>>, %arg10: memref<8x128xbf16, #tpu.memory_space<vmem>>, %arg11: memref<8x1024xbf16, #tpu.memory_space<vmem>>, %arg12: memref<8x128xf32, #tpu.memory_space<vmem>>, %arg13: memref<8x128xf32, #tpu.memory_space<vmem>>) attributes {dimension_semantics = [#tpu.dimension_semantics<parallel>, #tpu.dimension_semantics<arbitrary>], iteration_bounds = array<i64: 2, 8>, scalar_prefetch = 0 : i64, scratch_operands = 3 : i64, tpu.core_type = #tpu.core_type<tc>, window_params = [{transform_indices = @transform_0, window_bounds = array<i64: 8, 32>}, {pipeline_mode = #tpu.pipeline_mode<synchronous>, transform_indices = @transform_1, window_bounds = array<i64: 32, 1024>}, {pipeline_mode = #tpu.pipeline_mode<synchronous>, transform_indices = @transform_2, window_bounds = array<i64: 1, 1024>}, {transform_indices = @transform_3, window_bounds = array<i64: 1, 128, 128>}, {pipeline_mode = #tpu.pipeline_mode<synchronous>, transform_indices = @transform_4, window_bounds = array<i64: 1, 128>}, {transform_indices = @transform_5, window_bounds = array<i64: 1, 128, 128>}, {pipeline_mode = #tpu.pipeline_mode<synchronous>, transform_indices = @transform_6, window_bounds = array<i64: 1, 128>}, {transform_indices = @transform_7, window_bounds = array<i64: 8, 128>}, {transform_indices = @transform_8, window_bounds = array<i64: 8, 128>}]} {
    %c0_i32 = arith.constant 0 : i32
    %0 = arith.cmpi eq, %arg1, %c0_i32 : i32
    %1 = arith.extui %0 : i1 to i32
    %c0_i32_0 = arith.constant 0 : i32
    %2 = arith.cmpi ne, %1, %c0_i32_0 : i32
    scf.if %2 {
      %c0_22 = arith.constant 0 : index
      %c0_23 = arith.constant 0 : index
      %40 = vector.load %arg2[%c0_22, %c0_23] : memref<8x32xbf16, #tpu.memory_space<vmem>>, vector<8x32xbf16>
      %c0_24 = arith.constant 0 : index
      %c0_25 = arith.constant 0 : index
      %41 = vector.load %arg3[%c0_24, %c0_25] : memref<32x1024xbf16, #tpu.memory_space<vmem>>, vector<32x1024xbf16>
      %cst_26 = arith.constant dense<0.000000e+00> : vector<8x1024xf32>
      %42 = tpu.matmul %40, %41, %cst_26 {dimension_numbers = #tpu.dot_dimension_numbers<[1], [0], [0], [1], [0, 0, 1, 1], [], []>} : vector<8x32xbf16>, vector<32x1024xbf16>, vector<8x1024xf32> -> vector<8x1024xf32>
      %c0_27 = arith.constant 0 : index
      %c0_28 = arith.constant 0 : index
      %43 = vector.load %arg4[%c0_27, %c0_28] : memref<1x1024xf32, #tpu.memory_space<vmem>>, vector<1x1024xf32>
      %44 = vector.broadcast %43 : vector<1x1024xf32> to vector<8x1024xf32>
      %45 = arith.addf %42, %44 : vector<8x1024xf32>
      %46 = arith.truncf %45 : vector<8x1024xf32> to vector<8x1024xbf16>
      %c0_29 = arith.constant 0 : index
      %c0_30 = arith.constant 0 : index
      %47 = vector.load %arg11[%c0_29, %c0_30] : memref<8x1024xbf16, #tpu.memory_space<vmem>>, vector<8x1024xbf16>
      tpu.vector_store %arg11[%c0_29, %c0_30], %46 {strides = array<i32>} : memref<8x1024xbf16, #tpu.memory_space<vmem>>, vector<8x1024xbf16>,
      %cst_31 = arith.constant 0.000000e+00 : f32
      %48 = vector.broadcast %cst_31 : f32 to vector<8x128xf32>
      %c0_32 = arith.constant 0 : index
      %c0_33 = arith.constant 0 : index
      %49 = vector.load %arg12[%c0_32, %c0_33] : memref<8x128xf32, #tpu.memory_space<vmem>>, vector<8x128xf32>
      tpu.vector_store %arg12[%c0_32, %c0_33], %48 {strides = array<i32>} : memref<8x128xf32, #tpu.memory_space<vmem>>, vector<8x128xf32>,
      %cst_34 = arith.constant 0.000000e+00 : f32
      %50 = vector.broadcast %cst_34 : f32 to vector<8x128xf32>
      %c0_35 = arith.constant 0 : index
      %c0_36 = arith.constant 0 : index
      %51 = vector.load %arg13[%c0_35, %c0_36] : memref<8x128xf32, #tpu.memory_space<vmem>>, vector<8x128xf32>
      tpu.vector_store %arg13[%c0_35, %c0_36], %50 {strides = array<i32>} : memref<8x128xf32, #tpu.memory_space<vmem>>, vector<8x128xf32>,
    } else {
    }
    %c128_i32 = arith.constant 128 : i32
    %3 = arith.muli %arg1, %c128_i32 : i32
    %4 = tpu.assume_multiple %3, 128 : i32
    %c0 = arith.constant 0 : index
    %5 = arith.index_cast %4 : i32 to index
    %6 = vector.load %arg11[%c0, %5] : memref<8x1024xbf16, #tpu.memory_space<vmem>>, vector<8x128xbf16>
    %c0_1 = arith.constant 0 : index
    %c0_2 = arith.constant 0 : index
    %c0_3 = arith.constant 0 : index
    %7 = vector.load %arg5[%c0_1, %c0_2, %c0_3] : memref<1x128x128xbf16, #tpu.memory_space<vmem>>, vector<1x128x128xbf16>
    %8 = vector.shape_cast %7 : vector<1x128x128xbf16> to vector<128x128xbf16>
    %cst = arith.constant dense<0.000000e+00> : vector<8x128xf32>
    %9 = tpu.matmul %6, %8, %cst {dimension_numbers = #tpu.dot_dimension_numbers<[1], [0], [0], [1], [0, 0, 1, 1], [], []>} : vector<8x128xbf16>, vector<128x128xbf16>, vector<8x128xf32> -> vector<8x128xf32>
    %c0_4 = arith.constant 0 : index
    %c0_5 = arith.constant 0 : index
    %10 = vector.load %arg6[%c0_4, %c0_5] : memref<1x128xf32, #tpu.memory_space<vmem>>, vector<1x128xf32>
    %11 = vector.broadcast %10 : vector<1x128xf32> to vector<8x128xf32>
    %12 = arith.addf %9, %11 : vector<8x128xf32>
    %cst_6 = arith.constant dense<0xFF800000> : vector<8xf32>
    %13 = vector.multi_reduction <maximumf>, %12, %cst_6 [1] : vector<8x128xf32> to vector<8xf32>
    %14 = vector.shape_cast %13 : vector<8xf32> to vector<8x1xf32>
    %15 = vector.broadcast %14 : vector<8x1xf32> to vector<8x128xf32>
    %16 = arith.subf %12, %15 : vector<8x128xf32>
    %17 = math.exp %16 : vector<8x128xf32>
    %cst_7 = arith.constant dense<0.000000e+00> : vector<8xf32>
    %18 = vector.multi_reduction <add>, %17, %cst_7 [1] : vector<8x128xf32> to vector<8xf32>
    %19 = vector.shape_cast %18 : vector<8xf32> to vector<8x1xf32>
    %20 = tpu.reciprocal %19 {approx = true} : vector<8x1xf32> -> vector<8x1xf32>
    %21 = arith.mulf %19, %20 : vector<8x1xf32>
    %cst_8 = arith.constant 2.000000e+00 : f32
    %22 = vector.broadcast %cst_8 : f32 to vector<8x1xf32>
    %23 = arith.subf %22, %21 : vector<8x1xf32>
    %24 = arith.mulf %20, %23 : vector<8x1xf32>
    %25 = vector.broadcast %24 : vector<8x1xf32> to vector<8x128xf32>
    %26 = arith.mulf %17, %25 : vector<8x128xf32>
    %c0_9 = arith.constant 0 : index
    %c0_10 = arith.constant 0 : index
    %27 = vector.load %arg13[%c0_9, %c0_10] : memref<8x128xf32, #tpu.memory_space<vmem>>, vector<8x128xf32>
    %28 = arith.addf %27, %26 : vector<8x128xf32>
    %c0_11 = arith.constant 0 : index
    %c0_12 = arith.constant 0 : index
    %29 = vector.load %arg13[%c0_11, %c0_12] : memref<8x128xf32, #tpu.memory_space<vmem>>, vector<8x128xf32>
    tpu.vector_store %arg13[%c0_11, %c0_12], %28 {strides = array<i32>} : memref<8x128xf32, #tpu.memory_space<vmem>>, vector<8x128xf32>,
    %c0_13 = arith.constant 0 : index
    %c0_14 = arith.constant 0 : index
    %30 = vector.load %arg12[%c0_13, %c0_14] : memref<8x128xf32, #tpu.memory_space<vmem>>, vector<8x128xf32>
    %31 = arith.truncf %26 : vector<8x128xf32> to vector<8x128xbf16>
    %c0_15 = arith.constant 0 : index
    %c0_16 = arith.constant 0 : index
    %c0_17 = arith.constant 0 : index
    %32 = vector.load %arg7[%c0_15, %c0_16, %c0_17] : memref<1x128x128xbf16, #tpu.memory_space<vmem>>, vector<1x128x128xbf16>
    %33 = vector.shape_cast %32 : vector<1x128x128xbf16> to vector<128x128xbf16>
    %cst_18 = arith.constant dense<0.000000e+00> : vector<8x128xf32>
    %34 = tpu.matmul %31, %33, %cst_18 {dimension_numbers = #tpu.dot_dimension_numbers<[1], [0], [0], [1], [0, 0, 1, 1], [], []>} : vector<8x128xbf16>, vector<128x128xbf16>, vector<8x128xf32> -> vector<8x128xf32>
    %35 = arith.addf %30, %34 : vector<8x128xf32>
    %c0_19 = arith.constant 0 : index
    %c0_20 = arith.constant 0 : index
    %36 = vector.load %arg12[%c0_19, %c0_20] : memref<8x128xf32, #tpu.memory_space<vmem>>, vector<8x128xf32>
    tpu.vector_store %arg12[%c0_19, %c0_20], %35 {strides = array<i32>} : memref<8x128xf32, #tpu.memory_space<vmem>>, vector<8x128xf32>,
    %c7_i32 = arith.constant 7 : i32
    %37 = arith.cmpi eq, %arg1, %c7_i32 : i32
    %38 = arith.extui %37 : i1 to i32
    %c0_i32_21 = arith.constant 0 : i32
    %39 = arith.cmpi ne, %38, %c0_i32_21 : i32
    scf.if %39 {
      %c0_22 = arith.constant 0 : index
      %c0_23 = arith.constant 0 : index
      %40 = vector.load %arg12[%c0_22, %c0_23] : memref<8x128xf32, #tpu.memory_space<vmem>>, vector<8x128xf32>
      %c0_24 = arith.constant 0 : index
      %c0_25 = arith.constant 0 : index
      %41 = vector.load %arg8[%c0_24, %c0_25] : memref<1x128xf32, #tpu.memory_space<vmem>>, vector<1x128xf32>
      %42 = vector.broadcast %41 : vector<1x128xf32> to vector<8x128xf32>
      %43 = arith.addf %40, %42 : vector<8x128xf32>
      %c0_26 = arith.constant 0 : index
      %c0_27 = arith.constant 0 : index
      %44 = vector.load %arg9[%c0_26, %c0_27] : memref<8x128xf32, #tpu.memory_space<vmem>>, vector<8x128xf32>
      tpu.vector_store %arg9[%c0_26, %c0_27], %43 {strides = array<i32>} : memref<8x128xf32, #tpu.memory_space<vmem>>, vector<8x128xf32>,
      %c0_28 = arith.constant 0 : index
      %c0_29 = arith.constant 0 : index
      %45 = vector.load %arg13[%c0_28, %c0_29] : memref<8x128xf32, #tpu.memory_space<vmem>>, vector<8x128xf32>
      %cst_30 = arith.constant 1.250000e-01 : f32
      %46 = vector.broadcast %cst_30 : f32 to vector<8x128xf32>
      %47 = arith.mulf %45, %46 : vector<8x128xf32>
      %48 = arith.truncf %47 : vector<8x128xf32> to vector<8x128xbf16>
      %c0_31 = arith.constant 0 : index
      %c0_32 = arith.constant 0 : index
      %49 = vector.load %arg10[%c0_31, %c0_32] : memref<8x128xbf16, #tpu.memory_space<vmem>>, vector<8x128xbf16>
      tpu.vector_store %arg10[%c0_31, %c0_32], %48 {strides = array<i32>} : memref<8x128xbf16, #tpu.memory_space<vmem>>, vector<8x128xbf16>,
    } else {
    }
    return
  }
  func.func @transform_0(%arg0: i32, %arg1: i32) -> (i32, i32) {
    %c0_i32 = arith.constant 0 : i32
    %c0_i32_0 = arith.constant 0 : i32
    return %arg0, %c0_i32 : i32, i32
  }
  func.func @transform_1(%arg0: i32, %arg1: i32) -> (i32, i32) {
    %c0_i32 = arith.constant 0 : i32
    %c0_i32_0 = arith.constant 0 : i32
    %c0_i32_1 = arith.constant 0 : i32
    return %c0_i32, %c0_i32_0 : i32, i32
  }
  func.func @transform_2(%arg0: i32, %arg1: i32) -> (i32, i32) {
    %c0_i32 = arith.constant 0 : i32
    %c0_i32_0 = arith.constant 0 : i32
    %c0_i32_1 = arith.constant 0 : i32
    return %c0_i32, %c0_i32_0 : i32, i32
  }
  func.func @transform_3(%arg0: i32, %arg1: i32) -> (i32, i32, i32) {
    %c0_i32 = arith.constant 0 : i32
    %c0_i32_0 = arith.constant 0 : i32
    %c0_i32_1 = arith.constant 0 : i32
    return %arg1, %c0_i32, %c0_i32_0 : i32, i32, i32
  }
  func.func @transform_4(%arg0: i32, %arg1: i32) -> (i32, i32) {
    %c0_i32 = arith.constant 0 : i32
    %c0_i32_0 = arith.constant 0 : i32
    %c0_i32_1 = arith.constant 0 : i32
    return %c0_i32, %c0_i32_0 : i32, i32
  }
  func.func @transform_5(%arg0: i32, %arg1: i32) -> (i32, i32, i32) {
    %c0_i32 = arith.constant 0 : i32
    %c0_i32_0 = arith.constant 0 : i32
    %c0_i32_1 = arith.constant 0 : i32
    return %arg1, %c0_i32, %c0_i32_0 : i32, i32, i32
  }
  func.func @transform_6(%arg0: i32, %arg1: i32) -> (i32, i32) {
    %c0_i32 = arith.constant 0 : i32
    %c0_i32_0 = arith.constant 0 : i32
    %c0_i32_1 = arith.constant 0 : i32
    return %c0_i32, %c0_i32_0 : i32, i32
  }
  func.func @transform_7(%arg0: i32, %arg1: i32) -> (i32, i32) {
    %c0_i32 = arith.constant 0 : i32
    %c0_i32_0 = arith.constant 0 : i32
    return %arg0, %c0_i32 : i32, i32
  }
  func.func @transform_8(%arg0: i32, %arg1: i32) -> (i32, i32) {
    %c0_i32 = arith.constant 0 : i32
    %c0_i32_0 = arith.constant 0 : i32
    return %arg0, %c0_i32 : i32, i32
  }
}

module attributes {stable_mosaic.version = 11 : i64} {
  func.func @_cross_attention_kernel(%arg0: i32, %arg1: i32, %arg2: memref<8x32xbf16, #tpu.memory_space<vmem>>, %arg3: memref<32x1024xbf16, #tpu.memory_space<vmem>>, %arg4: memref<1x1024xf32, #tpu.memory_space<vmem>>, %arg5: memref<1x128x128xbf16, #tpu.memory_space<vmem>>, %arg6: memref<1x128xf32, #tpu.memory_space<vmem>>, %arg7: memref<1x128x128xbf16, #tpu.memory_space<vmem>>, %arg8: memref<1x128xf32, #tpu.memory_space<vmem>>, %arg9: memref<8x128xf32, #tpu.memory_space<vmem>>, %arg10: memref<8x128xbf16, #tpu.memory_space<vmem>>, %arg11: memref<8x1024xbf16, #tpu.memory_space<vmem>>, %arg12: memref<8x128xf32, #tpu.memory_space<vmem>>, %arg13: memref<8x128xf32, #tpu.memory_space<vmem>>) attributes {dimension_semantics = [#tpu.dimension_semantics<parallel>, #tpu.dimension_semantics<arbitrary>], iteration_bounds = array<i64: 2, 8>, scalar_prefetch = 0 : i64, scratch_operands = 3 : i64, tpu.core_type = #tpu.core_type<tc>, window_params = [{transform_indices = @transform_0, window_bounds = array<i64: 8, 32>}, {pipeline_mode = #tpu.pipeline_mode<synchronous>, transform_indices = @transform_1, window_bounds = array<i64: 32, 1024>}, {pipeline_mode = #tpu.pipeline_mode<synchronous>, transform_indices = @transform_2, window_bounds = array<i64: 1, 1024>}, {transform_indices = @transform_3, window_bounds = array<i64: 1, 128, 128>}, {pipeline_mode = #tpu.pipeline_mode<synchronous>, transform_indices = @transform_4, window_bounds = array<i64: 1, 128>}, {transform_indices = @transform_5, window_bounds = array<i64: 1, 128, 128>}, {pipeline_mode = #tpu.pipeline_mode<synchronous>, transform_indices = @transform_6, window_bounds = array<i64: 1, 128>}, {transform_indices = @transform_7, window_bounds = array<i64: 8, 128>}, {transform_indices = @transform_8, window_bounds = array<i64: 8, 128>}]} {
    %c0_i32 = arith.constant 0 : i32
    %0 = arith.cmpi eq, %arg1, %c0_i32 : i32
    %1 = arith.extui %0 : i1 to i32
    %c0_i32_0 = arith.constant 0 : i32
    %2 = arith.cmpi ne, %1, %c0_i32_0 : i32
    scf.if %2 {
      %c0_22 = arith.constant 0 : index
      %c0_23 = arith.constant 0 : index
      %40 = vector.load %arg2[%c0_22, %c0_23] : memref<8x32xbf16, #tpu.memory_space<vmem>>, vector<8x32xbf16>
      %c0_24 = arith.constant 0 : index
      %c0_25 = arith.constant 0 : index
      %41 = vector.load %arg3[%c0_24, %c0_25] : memref<32x1024xbf16, #tpu.memory_space<vmem>>, vector<32x1024xbf16>
      %cst_26 = arith.constant dense<0.000000e+00> : vector<8x1024xf32>
      %42 = tpu.matmul %40, %41, %cst_26 {dimension_numbers = #tpu.dot_dimension_numbers<[1], [0], [0], [1], [0, 0, 1, 1], [], []>} : vector<8x32xbf16>, vector<32x1024xbf16>, vector<8x1024xf32> -> vector<8x1024xf32>
      %c0_27 = arith.constant 0 : index
      %c0_28 = arith.constant 0 : index
      %43 = vector.load %arg4[%c0_27, %c0_28] : memref<1x1024xf32, #tpu.memory_space<vmem>>, vector<1x1024xf32>
      %44 = vector.broadcast %43 : vector<1x1024xf32> to vector<8x1024xf32>
      %45 = arith.addf %42, %44 : vector<8x1024xf32>
      %46 = arith.truncf %45 : vector<8x1024xf32> to vector<8x1024xbf16>
      %c0_29 = arith.constant 0 : index
      %c0_30 = arith.constant 0 : index
      %47 = vector.load %arg11[%c0_29, %c0_30] : memref<8x1024xbf16, #tpu.memory_space<vmem>>, vector<8x1024xbf16>
      tpu.vector_store %arg11[%c0_29, %c0_30], %46 {strides = array<i32>} : memref<8x1024xbf16, #tpu.memory_space<vmem>>, vector<8x1024xbf16>,
      %cst_31 = arith.constant 0.000000e+00 : f32
      %48 = vector.broadcast %cst_31 : f32 to vector<8x128xf32>
      %c0_32 = arith.constant 0 : index
      %c0_33 = arith.constant 0 : index
      %49 = vector.load %arg12[%c0_32, %c0_33] : memref<8x128xf32, #tpu.memory_space<vmem>>, vector<8x128xf32>
      tpu.vector_store %arg12[%c0_32, %c0_33], %48 {strides = array<i32>} : memref<8x128xf32, #tpu.memory_space<vmem>>, vector<8x128xf32>,
      %cst_34 = arith.constant 0.000000e+00 : f32
      %50 = vector.broadcast %cst_34 : f32 to vector<8x128xf32>
      %c0_35 = arith.constant 0 : index
      %c0_36 = arith.constant 0 : index
      %51 = vector.load %arg13[%c0_35, %c0_36] : memref<8x128xf32, #tpu.memory_space<vmem>>, vector<8x128xf32>
      tpu.vector_store %arg13[%c0_35, %c0_36], %50 {strides = array<i32>} : memref<8x128xf32, #tpu.memory_space<vmem>>, vector<8x128xf32>,
    } else {
    }
    %c128_i32 = arith.constant 128 : i32
    %3 = arith.muli %arg1, %c128_i32 : i32
    %4 = tpu.assume_multiple %3, 128 : i32
    %c0 = arith.constant 0 : index
    %5 = arith.index_cast %4 : i32 to index
    %6 = vector.load %arg11[%c0, %5] : memref<8x1024xbf16, #tpu.memory_space<vmem>>, vector<8x128xbf16>
    %c0_1 = arith.constant 0 : index
    %c0_2 = arith.constant 0 : index
    %c0_3 = arith.constant 0 : index
    %7 = vector.load %arg5[%c0_1, %c0_2, %c0_3] : memref<1x128x128xbf16, #tpu.memory_space<vmem>>, vector<1x128x128xbf16>
    %8 = vector.shape_cast %7 : vector<1x128x128xbf16> to vector<128x128xbf16>
    %cst = arith.constant dense<0.000000e+00> : vector<8x128xf32>
    %9 = tpu.matmul %6, %8, %cst {dimension_numbers = #tpu.dot_dimension_numbers<[1], [0], [0], [1], [0, 0, 1, 1], [], []>} : vector<8x128xbf16>, vector<128x128xbf16>, vector<8x128xf32> -> vector<8x128xf32>
    %c0_4 = arith.constant 0 : index
    %c0_5 = arith.constant 0 : index
    %10 = vector.load %arg6[%c0_4, %c0_5] : memref<1x128xf32, #tpu.memory_space<vmem>>, vector<1x128xf32>
    %11 = vector.broadcast %10 : vector<1x128xf32> to vector<8x128xf32>
    %12 = arith.addf %9, %11 : vector<8x128xf32>
    %cst_6 = arith.constant dense<0xFF800000> : vector<8xf32>
    %13 = vector.multi_reduction <maximumf>, %12, %cst_6 [1] : vector<8x128xf32> to vector<8xf32>
    %14 = vector.shape_cast %13 : vector<8xf32> to vector<8x1xf32>
    %15 = vector.broadcast %14 : vector<8x1xf32> to vector<8x128xf32>
    %16 = arith.subf %12, %15 : vector<8x128xf32>
    %17 = math.exp %16 : vector<8x128xf32>
    %cst_7 = arith.constant dense<0.000000e+00> : vector<8xf32>
    %18 = vector.multi_reduction <add>, %17, %cst_7 [1] : vector<8x128xf32> to vector<8xf32>
    %19 = vector.shape_cast %18 : vector<8xf32> to vector<8x1xf32>
    %20 = tpu.reciprocal %19 {approx = true} : vector<8x1xf32> -> vector<8x1xf32>
    %21 = arith.mulf %19, %20 : vector<8x1xf32>
    %cst_8 = arith.constant 2.000000e+00 : f32
    %22 = vector.broadcast %cst_8 : f32 to vector<8x1xf32>
    %23 = arith.subf %22, %21 : vector<8x1xf32>
    %24 = arith.mulf %20, %23 : vector<8x1xf32>
    %25 = vector.broadcast %24 : vector<8x1xf32> to vector<8x128xf32>
    %26 = arith.mulf %17, %25 : vector<8x128xf32>
    %c0_9 = arith.constant 0 : index
    %c0_10 = arith.constant 0 : index
    %27 = vector.load %arg13[%c0_9, %c0_10] : memref<8x128xf32, #tpu.memory_space<vmem>>, vector<8x128xf32>
    %28 = arith.addf %27, %26 : vector<8x128xf32>
    %c0_11 = arith.constant 0 : index
    %c0_12 = arith.constant 0 : index
    %29 = vector.load %arg13[%c0_11, %c0_12] : memref<8x128xf32, #tpu.memory_space<vmem>>, vector<8x128xf32>
    tpu.vector_store %arg13[%c0_11, %c0_12], %28 {strides = array<i32>} : memref<8x128xf32, #tpu.memory_space<vmem>>, vector<8x128xf32>,
    %c0_13 = arith.constant 0 : index
    %c0_14 = arith.constant 0 : index
    %30 = vector.load %arg12[%c0_13, %c0_14] : memref<8x128xf32, #tpu.memory_space<vmem>>, vector<8x128xf32>
    %31 = arith.truncf %26 : vector<8x128xf32> to vector<8x128xbf16>
    %c0_15 = arith.constant 0 : index
    %c0_16 = arith.constant 0 : index
    %c0_17 = arith.constant 0 : index
    %32 = vector.load %arg7[%c0_15, %c0_16, %c0_17] : memref<1x128x128xbf16, #tpu.memory_space<vmem>>, vector<1x128x128xbf16>
    %33 = vector.shape_cast %32 : vector<1x128x128xbf16> to vector<128x128xbf16>
    %cst_18 = arith.constant dense<0.000000e+00> : vector<8x128xf32>
    %34 = tpu.matmul %31, %33, %cst_18 {dimension_numbers = #tpu.dot_dimension_numbers<[1], [0], [0], [1], [0, 0, 1, 1], [], []>} : vector<8x128xbf16>, vector<128x128xbf16>, vector<8x128xf32> -> vector<8x128xf32>
    %35 = arith.addf %30, %34 : vector<8x128xf32>
    %c0_19 = arith.constant 0 : index
    %c0_20 = arith.constant 0 : index
    %36 = vector.load %arg12[%c0_19, %c0_20] : memref<8x128xf32, #tpu.memory_space<vmem>>, vector<8x128xf32>
    tpu.vector_store %arg12[%c0_19, %c0_20], %35 {strides = array<i32>} : memref<8x128xf32, #tpu.memory_space<vmem>>, vector<8x128xf32>,
    %c7_i32 = arith.constant 7 : i32
    %37 = arith.cmpi eq, %arg1, %c7_i32 : i32
    %38 = arith.extui %37 : i1 to i32
    %c0_i32_21 = arith.constant 0 : i32
    %39 = arith.cmpi ne, %38, %c0_i32_21 : i32
    scf.if %39 {
      %c0_22 = arith.constant 0 : index
      %c0_23 = arith.constant 0 : index
      %40 = vector.load %arg12[%c0_22, %c0_23] : memref<8x128xf32, #tpu.memory_space<vmem>>, vector<8x128xf32>
      %c0_24 = arith.constant 0 : index
      %c0_25 = arith.constant 0 : index
      %41 = vector.load %arg8[%c0_24, %c0_25] : memref<1x128xf32, #tpu.memory_space<vmem>>, vector<1x128xf32>
      %42 = vector.broadcast %41 : vector<1x128xf32> to vector<8x128xf32>
      %43 = arith.addf %40, %42 : vector<8x128xf32>
      %c0_26 = arith.constant 0 : index
      %c0_27 = arith.constant 0 : index
      %44 = vector.load %arg9[%c0_26, %c0_27] : memref<8x128xf32, #tpu.memory_space<vmem>>, vector<8x128xf32>
      tpu.vector_store %arg9[%c0_26, %c0_27], %43 {strides = array<i32>} : memref<8x128xf32, #tpu.memory_space<vmem>>, vector<8x128xf32>,
      %c0_28 = arith.constant 0 : index
      %c0_29 = arith.constant 0 : index
      %45 = vector.load %arg13[%c0_28, %c0_29] : memref<8x128xf32, #tpu.memory_space<vmem>>, vector<8x128xf32>
      %cst_30 = arith.constant 1.250000e-01 : f32
      %46 = vector.broadcast %cst_30 : f32 to vector<8x128xf32>
      %47 = arith.mulf %45, %46 : vector<8x128xf32>
      %48 = arith.truncf %47 : vector<8x128xf32> to vector<8x128xbf16>
      %c0_31 = arith.constant 0 : index
      %c0_32 = arith.constant 0 : index
      %49 = vector.load %arg10[%c0_31, %c0_32] : memref<8x128xbf16, #tpu.memory_space<vmem>>, vector<8x128xbf16>
      tpu.vector_store %arg10[%c0_31, %c0_32], %48 {strides = array<i32>} : memref<8x128xbf16, #tpu.memory_space<vmem>>, vector<8x128xbf16>,
    } else {
    }
    return
  }
  func.func @transform_0(%arg0: i32, %arg1: i32) -> (i32, i32) {
    %c0_i32 = arith.constant 0 : i32
    %c0_i32_0 = arith.constant 0 : i32
    return %arg0, %c0_i32 : i32, i32
  }
  func.func @transform_1(%arg0: i32, %arg1: i32) -> (i32, i32) {
    %c0_i32 = arith.constant 0 : i32
    %c0_i32_0 = arith.constant 0 : i32
    %c0_i32_1 = arith.constant 0 : i32
    return %c0_i32, %c0_i32_0 : i32, i32
  }
  func.func @transform_2(%arg0: i32, %arg1: i32) -> (i32, i32) {
    %c0_i32 = arith.constant 0 : i32
    %c0_i32_0 = arith.constant 0 : i32
    %c0_i32_1 = arith.constant 0 : i32
    return %c0_i32, %c0_i32_0 : i32, i32
  }
  func.func @transform_3(%arg0: i32, %arg1: i32) -> (i32, i32, i32) {
    %c0_i32 = arith.constant 0 : i32
    %c0_i32_0 = arith.constant 0 : i32
    %c0_i32_1 = arith.constant 0 : i32
    return %arg1, %c0_i32, %c0_i32_0 : i32, i32, i32
  }
  func.func @transform_4(%arg0: i32, %arg1: i32) -> (i32, i32) {
    %c0_i32 = arith.constant 0 : i32
    %c0_i32_0 = arith.constant 0 : i32
    %c0_i32_1 = arith.constant 0 : i32
    return %c0_i32, %c0_i32_0 : i32, i32
  }
  func.func @transform_5(%arg0: i32, %arg1: i32) -> (i32, i32, i32) {
    %c0_i32 = arith.constant 0 : i32
    %c0_i32_0 = arith.constant 0 : i32
    %c0_i32_1 = arith.constant 0 : i32
    return %arg1, %c0_i32, %c0_i32_0 : i32, i32, i32
  }
  func.func @transform_6(%arg0: i32, %arg1: i32) -> (i32, i32) {
    %c0_i32 = arith.constant 0 : i32
    %c0_i32_0 = arith.constant 0 : i32
    %c0_i32_1 = arith.constant 0 : i32
    return %c0_i32, %c0_i32_0 : i32, i32
  }
  func.func @transform_7(%arg0: i32, %arg1: i32) -> (i32, i32) {
    %c0_i32 = arith.constant 0 : i32
    %c0_i32_0 = arith.constant 0 : i32
    return %arg0, %c0_i32 : i32, i32
  }
  func.func @transform_8(%arg0: i32, %arg1: i32) -> (i32, i32) {
    %c0_i32 = arith.constant 0 : i32
    %c0_i32_0 = arith.constant 0 : i32
    return %arg0, %c0_i32 : i32, i32
  }
}

</mosaic_0001>

<bundles_post_ra>
// kernel: tpu_custom_call.1
= control target key start
LH: loop header
LB: loop body
LE: loop exit
PB: predicated region body
PF: predicated region fallthrough
CT: control target
= control target key end

     0   :  { %s2421_s0 = inlined_call_operand.hbm [shape: bf16[16,32], index: 0, kind: input, shape index: {}]   ;;  %s2422_s1 = inlined_call_operand.hbm [shape: bf16[32,1024], index: 1, kind: input, shape index: {}]   ;;  %s2423_s2 = inlined_call_operand.hbm [shape: f32[1,1024], index: 2, kind: input, shape index: {}]   ;;  %s2424_s3 = inlined_call_operand.hbm [shape: bf16[8,128,128], index: 3, kind: input, shape index: {}]   ;;  %s2425_s4 = inlined_call_operand.vmem [shape: f32[1,128], index: 4, kind: input, shape index: {}]   ;;  %s2426_s5 = inlined_call_operand.hbm [shape: bf16[8,128,128], index: 5, kind: input, shape index: {}]   ;;  %s2427_s6 = inlined_call_operand.vmem [shape: f32[1,128], index: 6, kind: input, shape index: {}]   ;;  %s2428_s7 = inlined_call_operand.hbm [shape: f32[16,128], index: 7, kind: output, shape index: {0}]   ;;  %s2429_s8 = inlined_call_operand.hbm [shape: bf16[16,128], index: 8, kind: output, shape index: {1}]  }
   0x1   :  { %2454 = sst [smem:[#allocation31_spill]] %s2422_s1 }
   0x2   :  { %2455 = sst [smem:[#allocation32_spill]] %s2424_s3 }
   0x3   :  { %2456 = sst [smem:[#allocation33_spill]] %s2425_s4 }
   0x4   :  { %2457 = sst [smem:[#allocation34_spill]] %s2427_s6 }
   0x5   :  { %2458 = sst [smem:[#allocation35_spill]] %s2428_s7 }
   0x6   :  { %2459 = sst [smem:[#allocation36_spill]] %s2429_s8 }
   0x7   :  { %14 = vsyncpa [#allocation6], 0 }
   0x8   :  { %16 = vsyncpa [#allocation6 + $0x1], 0 }
   0x9   :  { %17 = vsyncpa [#allocation9], 0 }
   0xa   :  { %18 = vsyncpa [#allocation12], 0 }
   0xb   :  { %20 = vsyncpa [#allocation12 + $0x1], 0 }
   0xc   :  { %21 = vsyncpa [#allocation7], 0 }
   0xd   :  { %23 = vsyncpa [#allocation7 + $0x1], 0 }
   0xe   :  { %24 = vsyncpa [#allocation16], 0 }
   0xf   :  { %26 = vsyncpa [#allocation16 + $0x1], 0  ;;  %s1939_s27 = smov 0   ;;  %s1941_s28 = smov 0  }
  0x10   :  { %s1943_s29 = smov 0   ;;  %s1945_s30 = smov 0  }
  0x11   :  { %s1947_s9 = smov 0   ;;  %s1949_s10 = smov 0  }
  0x12   :  { %s1951_s11 = smov 0   ;;  %s1953_s12 = smov 0  }
  0x13   :  { %s1955_s13 = smov 0   ;;  %s1957_s14 = smov 0  }
  0x14   :  { %s1959_s15 = smov 0  }
  0x15 LB: > { %2460 = sst [smem:[#allocation22_spill]] %s1841_s28  ;;  %s1993_s16 = sadd.s32 4294967295, %s1877_s15   ;;  %s1877_s15 = sphi %s1959_s15, %s32_s15   ;;  %s1873_s14 = sphi %s1957_s14, %s2518_s14   ;;  %s1869_s13 = sphi %s1955_s13, %s2517_s13   ;;  %s1865_s12 = sphi %s1953_s12, %s2516_s12   ;;  %s1861_s11 = sphi %s1951_s11, %s2515_s11   ;;  %s1857_s10 = sphi %s1949_s10, %s2514_s10   ;;  %s1853_s9 = sphi %s1947_s9, %s2513_s9   ;;  %s1849_s30 = sphi %s1945_s30, %s2512_s30   ;;  %s1845_s29 = sphi %s1943_s29, %s2510_s29   ;;  %s1841_s28 = sphi %s1941_s28, %s2509_s28   ;;  %s1837_s27 = sphi %s1939_s27, %s2508_s27  }
  0x16   : > { %2461 = sst [smem:[#allocation23_spill]] %s1845_s29  ;;  %p132_p0 = scmp.ne.s32.totalorder %s1841_s28, %s1837_s27 }
  0x17   : > { %2462 = sst [smem:[#allocation24_spill]] %s1861_s11  ;;  %p2432_p1 = scmp.eq.s32.totalorder %s1993_s16, 0 }
  0x18   : > { %2463 = sst [smem:[#allocation25_spill]] %s1865_s12  ;;  %p1267_p2 = scmp.ge.s32.totalorder %s1877_s15, 1 }
  0x19   : > { %p263_p3 = scmp.lt.s32.totalorder %s1877_s15, 17  ;;  %p2001_p4 = por %p132_p0, %p2432_p1 }
  0x1a   : > { %s1879_s19 = smov [#allocation8]   ;;  %s41_s22 = sadd.s32 1, %s1869_s13 }
  0x1b   : > { %s2464_s17 = scalar_select %p2001_p4, 1, 0 }
  0x1c   : > { %p2005_p5 = pnand %p1267_p2, %p263_p3  ;;  %s275_s20 = sshll.u32 %s1879_s19, 4  ;;  %s276_s20 = int_to_ptr.vmem [resolvable:$true] %s275_s20 }
  0x1d   : > { %2465 = sst [smem:[#allocation26_spill]] %s2464_s17  ;;  %s2469_s1 = sld [smem:[#allocation31_spill]] }
  0x1e   : > { %s2466_s18 = scalar_select %p2005_p5, 1, 0 }
  0x1f   : > { %p1421_p6 = pneg %p2005_p5 }
  0x20   : > { %2467 = sst [smem:[#allocation27_spill]] %s2466_s18 }
  0x21   : > { %p2013_p7 = pnand %p1421_p6, %p2432_p1 }
  0x23   : > { %s1569_s25 = scalar_lea.hbm %s2469_s1, 2048  ;;  %p2441_p9 = pneg %p2013_p7 }
  0x24   : > { %p1570_p8 = scmp.ne.s32.totalorder %s2469_s1, %s1569_s25  ;;  %p1576_p12 = scmp.lt.u32.totalorder %s1569_s25, %s2469_s1 }
  0x26   : > { %p1572_p10 = pnand %p2441_p9, %p1570_p8 }
  0x28   : > { %p1573_p11 = pneg %p1572_p10 }
  0x2a   : > { %p1578_p13 = pnand %p1576_p12, %p1573_p11 }
  0x2c   : > { %1581 = shalt.err (!%p1578_p13)
}
  0x2d   : > { %s1582_s7 = scalar_lea.vmem %s276_s20, 2048  ;;  %p1590_p6 = scmp.lt.s32.totalorder %s276_s20, %s276_s20 }
  0x2e   : > { %p1583_p0 = scmp.ne.s32.totalorder %s276_s20, %s1582_s7  ;;  %p1591_p1 = scmp.lt.s32.totalorder %s1582_s7, %s1582_s7 }
  0x30   : > { %p1585_p2 = pnand %p1583_p0, %p2441_p9  ;;  %p1592_p4 = por %p1591_p1, %p1590_p6 }
  0x32   : > { %p1586_p3 = pneg %p1585_p2 }
  0x34   : > { %p1593_p5 = pnand %p1592_p4, %p1586_p3 }
  0x36   : > { %1596 = shalt.err (!%p1593_p5)
}
  0x37   : > { %s1880_s23 = smov 512   ;;  %s1881_s8 = smov 32  }
  0x38   : > { %1424 = dma.hbm_to_vmem [thread:$0]  (!%p2013_p7), %s2469_s1, 2048, %s276_s20, [#allocation9], %s1880_s23, %s1880_s23, %s1881_s8  }
  0x39   : > { %p2040_p1 = scmp.ge.s32.totalorder %s41_s22, 8  ;;  %p2440_p4 = scmp.eq.s32.totalorder %s1877_s15, 0 }
  0x3a   : > { %s119_s26 = sadd.s32 1, %s1845_s29  ;;  %p126_p5 = scmp.ne.s32.totalorder %s1845_s29, %s1841_s28 }
  0x3b   : > { %s2470_s25 = scalar_select %p2040_p1, 1, 0 }
  0x3c   : > { %s2520_s22 = smov (%p2040_p1, %s41_s22), 0  ;;  %p128_p8 = por %p126_p5, %p2440_p4 }
  0x3d   : > { %2471 = sst [smem:[#allocation28_spill]] %s2520_s22  ;;  %p2439_p10 = scmp.lt.s32.totalorder %s1877_s15, 16 }
  0x3e   : > { %s116_s27 = ssub.s32 %s1869_s13, %s2520_s22  ;;  %s324_s19 = sand.u32 1, %s1877_s15  }
  0x3f   : > { %p117_p11 = scmp.eq.s32.totalorder %s116_s27, 0  ;;  %s326_s20 = sand.u32 1, %s1845_s29  }
  0x40   : > { %s2437_s23 = sshll.u32 %s1869_s13, 10  ;;  %s2063_s24 = sshll.u32 %s326_s20, 6 }
  0x41   : > { %s2061_s8 = scalar_select %p117_p11, %s1845_s29, %s119_s26  }
  0x42   : > { %s2473_s3 = sld [smem:[#allocation32_spill]]  ;;  %p2074_p12 = pnand %p2439_p10, %p128_p8 }
  0x43   : > { %2472 = sst [smem:[#allocation29_spill]] %s2061_s8  ;;  %s328_s26 = scalar_lea.vmem [#allocation11], %s2063_s24 }
  0x44   : > { %s2474_s27 = scalar_select %p2074_p12, 1, 0 }
  0x45   : > { %s335_s20 = sshll.u32 %s328_s26, 4  ;;  %s2081_s22 = scalar_lea.sflag [#allocation12], %s324_s19  ;;  %s2079_s20 = int_to_ptr.vmem [resolvable:$true] %s335_s20 }
  0x46   : > { %2475 = sst [smem:[#allocation30_spill]] %s2474_s27  ;;  %p2450_p0 = pneg %p2074_p12 }
  0x48   : > { %s2070_s12 = scalar_lea.hbm %s2473_s3, %s2437_s23  ;;  %s1602_s8 = scalar_lea.hbm %s2473_s3, 8192 }
  0x49   : > { %s1597_s1 = scalar_lea.hbm %s2070_s12, 1024  ;;  %p1603_p6 = scmp.lt.u32.totalorder %s2070_s12, %s2473_s3 }
  0x4a   : > { %p1598_p13 = scmp.ne.s32.totalorder %s2070_s12, %s1597_s1  ;;  %p1604_p5 = scmp.lt.u32.totalorder %s1602_s8, %s1597_s1 }
  0x4b   : > { %p1606_p11 = scmp.lt.u32.totalorder %s1597_s1, %s2070_s12 }
  0x4c   : > { %p1600_p2 = pnand %p2450_p0, %p1598_p13  ;;  %p1605_p8 = por %p1604_p5, %p1603_p6 }
  0x4e   : > { %p1601_p3 = pneg %p1600_p2  ;;  %p1607_p10 = por %p1606_p11, %p1605_p8 }
  0x50   : > { %p1608_p4 = pnand %p1607_p10, %p1601_p3 }
  0x52   : > { %1611 = shalt.err (!%p1608_p4)
}
  0x53   : > { %s1612_s19 = scalar_lea.vmem %s2079_s20, 1024  ;;  %s1882_s23 = smov [#allocation11]  }
  0x54   : > { %p1613_p13 = scmp.ne.s32.totalorder %s2079_s20, %s1612_s19  ;;  %s1617_s26 = sshll.u32 %s1882_s23, 4  ;;  %s1618_s26 = int_to_ptr.vmem [resolvable:$false] %s1617_s26 }
  0x55   : > { %s1619_s6 = scalar_lea.vmem %s1618_s26, 2048  ;;  %p1620_p1 = scmp.lt.s32.totalorder %s2079_s20, %s1618_s26 }
  0x56   : > { %p1615_p2 = pnand %p1613_p13, %p2450_p0  ;;  %p1621_p6 = scmp.lt.s32.totalorder %s1619_s6, %s1612_s19 }
  0x58   : > { %p1616_p9 = pneg %p1615_p2  ;;  %p1622_p5 = por %p1621_p6, %p1620_p1 }
  0x5a   : > { %p1623_p8 = pnand %p1622_p5, %p1616_p9 }
  0x5c   : > { %1626 = shalt.err (!%p1623_p8)
}
  0x5d   : > { %s1883_s29 = smov 64   ;;  %s1884_s8 = smov 4  }
  0x5e   : > { %1434 = dma.hbm_to_vmem [thread:$0]  (!%p2074_p12), %s2070_s12, 1024, %s2079_s20, %s2081_s22, %s1883_s29, %s1883_s29, %s1884_s8  }
  0x5f   : > { %s2476_s1 = sshll.u32 %s1869_s13, 10  ;;  %s349_s26 = scalar_lea.vmem [#allocation13], %s2063_s24 }
  0x60   : > { %s2117_s23 = scalar_lea.hbm %s2426_s5, %s2476_s1  ;;  %s2120_s6 = sshll.u32 %s349_s26, 4  ;;  %s2196_s6 = int_to_ptr.vmem [resolvable:$true] %s2120_s6 }
  0x61   : > { %s1885_s3 = smov [#allocation10]   ;;  %s1627_s28 = scalar_lea.hbm %s2423_s2, 128 }
  0x62   : > { %s289_s4 = sshll.u32 %s1885_s3, 4  ;;  %p1628_p9 = scmp.ne.s32.totalorder %s2423_s2, %s1627_s28  ;;  %s290_s4 = int_to_ptr.vmem [resolvable:$true] %s289_s4 }
  0x63   : > { %p2477_p1 = pneg %p2013_p7  ;;  %p1634_p3 = scmp.lt.u32.totalorder %s1627_s28, %s2423_s2 }
  0x65   : > { %p1630_p4 = pnand %p1628_p9, %p2477_p1 }
  0x67   : > { %p1631_p10 = pneg %p1630_p4 }
  0x69   : > { %p1636_p11 = pnand %p1634_p3, %p1631_p10 }
  0x6b   : > { %1639 = shalt.err (!%p1636_p11)
}
  0x6c   : > { %s1640_s3 = scalar_lea.vmem %s290_s4, 128  ;;  %p2478_p2 = pmov %p2477_p1 }
  0x6d   : > { %p1641_p13 = scmp.ne.s32.totalorder %s290_s4, %s1640_s3  ;;  %p1648_p8 = scmp.lt.s32.totalorder %s290_s4, %s290_s4 }
  0x6e   : > { %p1649_p0 = scmp.lt.s32.totalorder %s1640_s3, %s1640_s3 }
  0x6f   : > { %p1643_p6 = pnand %p1641_p13, %p2478_p2 }
  0x70   : > { %p1650_p12 = por %p1649_p0, %p1648_p8 }
  0x71   : > { %p1644_p5 = pneg %p1643_p6 }
  0x73   : > { %p1651_p1 = pnand %p1650_p12, %p1644_p5 }
  0x75   : > { %1654 = shalt.err (!%p1651_p1)
}
  0x76   : > { %1427 = dma.hbm_to_vmem [thread:$0]  (!%p2013_p7), %s2423_s2, 128, %s290_s4, [#allocation9]  }
  0x77   : > { %s1266_s28 = sadd.s32 4294967294, %s1877_s15   ;;  %s44_s18 = sadd.s32 1, %s1873_s14 }
  0x78   : > { %p2479_p12 = scmp.ne.s32.totalorder %s2470_s25, 0  ;;  %s51_s21 = sadd.s32 1, %s1857_s10 }
  0x79   : > { %p58_p0 = scmp.ne.s32.totalorder %s1857_s10, %s1853_s9  ;;  %p64_p4 = scmp.ne.s32.totalorder %s1853_s9, %s1849_s30 }
  0x7a   : > { %s2522_s18 = smov (!%p2479_p12, %s44_s18), %s1873_s14  ;;  %p2480_p10 = scmp.eq.s32.totalorder %s1877_s15, 0 }
  0x7b   : > { %p46_p9 = scmp.ge.s32.totalorder %s2522_s18, 2  ;;  %p224_p11 = scmp.eq.s32.totalorder %s1993_s16, 15 }
  0x7c   : > { %p2154_p3 = por %p2480_p10, %p58_p0  ;;  %p2482_p7 = scmp.eq.s32.totalorder %s1993_s16, 0 }
  0x7d   : > { %s2524_s18 = smov (%p46_p9, %s2522_s18), 0  ;;  %p2167_p2 = por %p224_p11, %p58_p0 }
  0x7e   : > { %p2163_p13 = por %p2482_p7, %p64_p4  ;;  %s48_s27 = ssub.s32 %s1873_s14, %s2524_s18 }
  0x7f   : > { %s2484_s25 = scalar_select %p2167_p2, 1, 0 }
  0x80   : > { %p230_p6 = scmp.eq.s32.totalorder %s1266_s28, 15  ;;  %p49_p5 = scmp.eq.s32.totalorder %s48_s27, 0 }
  0x81   : > { %s306_s1 = sand.u32 1, %s1857_s10   ;;  %s1272_s12 = sshll.u32 %s1873_s14, 6 }
  0x82   : > { %p2174_p8 = por %p230_p6, %p64_p4  ;;  %s1271_s26 = sshll.u32 %s306_s1, 2 }
  0x83   : > { %s2179_s19 = scalar_select %p49_p5, %s1857_s10, %s51_s21  }
  0x84   : > { %s2485_s7 = scalar_select %p2174_p8, 1, 0 }
  0x85   : > { %s2185_s11 = scalar_lea.hbm %s2421_s0, %s1272_s12  ;;  %s310_s17 = scalar_lea.vmem [#allocation5], %s1271_s26 }
  0x86   : > { %s317_s28 = sshll.u32 %s310_s17, 4  ;;  %p2486_p1 = scmp.lt.s32.totalorder %s1877_s15, 16  ;;  %s2198_s28 = int_to_ptr.vmem [resolvable:$true] %s317_s28 }
  0x87   : > { %s307_s21 = scalar_lea.sflag [#allocation6], %s306_s1  ;;  %s1655_s12 = scalar_lea.hbm %s2185_s11, 64 }
  0x88   : > { %p2191_p12 = pnand %p2486_p1, %p2154_p3  ;;  %p1656_p0 = scmp.ne.s32.totalorder %s2185_s11, %s1655_s12 }
  0x89   : > { %s1660_s20 = scalar_lea.hbm %s2421_s0, 128  ;;  %p1661_p3 = scmp.lt.u32.totalorder %s2185_s11, %s2421_s0 }
  0x8a   : > { %p1657_p9 = pneg %p2191_p12  ;;  %p1662_p11 = scmp.lt.u32.totalorder %s1660_s20, %s1655_s12 }
  0x8b   : > { %p1664_p6 = scmp.lt.u32.totalorder %s1655_s12, %s2185_s11 }
  0x8c   : > { %p1658_p4 = pnand %p1657_p9, %p1656_p0  ;;  %p1663_p7 = por %p1662_p11, %p1661_p3 }
  0x8e   : > { %p1659_p10 = pneg %p1658_p4  ;;  %p1665_p5 = por %p1664_p6, %p1663_p7 }
  0x90   : > { %p1666_p1 = pnand %p1665_p5, %p1659_p10 }
  0x92   : > { %1669 = shalt.err (!%p1666_p1)
}
  0x93   : > { %s1670_s1 = scalar_lea.vmem %s2198_s28, 64  ;;  %s1886_s24 = smov [#allocation5]  }
  0x94   : > { %p1671_p0 = scmp.ne.s32.totalorder %s2198_s28, %s1670_s1  ;;  %s1675_s26 = sshll.u32 %s1886_s24, 4  ;;  %s1676_s26 = int_to_ptr.vmem [resolvable:$false] %s1675_s26 }
  0x95   : > { %s1677_s3 = scalar_lea.vmem %s1676_s26, 128  ;;  %p1678_p2 = scmp.lt.s32.totalorder %s2198_s28, %s1676_s26 }
  0x96   : > { %p1673_p4 = pnand %p1671_p0, %p1657_p9  ;;  %p1679_p3 = scmp.lt.s32.totalorder %s1677_s3, %s1670_s1 }
  0x98   : > { %p1674_p8 = pneg %p1673_p4  ;;  %p1680_p11 = por %p1679_p3, %p1678_p2 }
  0x9a   : > { %p1681_p7 = pnand %p1680_p11, %p1674_p8 }
  0x9c   : > { %1684 = shalt.err (!%p1681_p7)
}
  0x9d   : > { %s2488_s12 = sld [smem:[#allocation30_spill]]  ;;  %s1685_s20 = scalar_lea.hbm %s2117_s23, 1024 }
  0x9e   : > { %1431 = dma.hbm_to_vmem [thread:$0]  (!%p2191_p12), %s2185_s11, 64, %s2198_s28, %s307_s21  }
  0x9f   : > { %p1686_p9 = scmp.ne.s32.totalorder %s2117_s23, %s1685_s20  ;;  %s1690_s24 = scalar_lea.hbm %s2426_s5, 8192 }
  0xa0   : > { %p1691_p2 = scmp.lt.u32.totalorder %s2117_s23, %s2426_s5  ;;  %p1692_p8 = scmp.lt.u32.totalorder %s1690_s24, %s1685_s20 }
  0xa1   : > { %p1694_p4 = scmp.lt.u32.totalorder %s1685_s20, %s2117_s23 }
  0xa2   : > { %p1693_p0 = por %p1692_p8, %p1691_p2 }
  0xa3   : > { %p2489_p10 = scmp.ne.s32.totalorder %s2488_s12, 0 }
  0xa4   : > { %p1695_p3 = por %p1694_p4, %p1693_p0 }
  0xa5   : > { %p2490_p6 = pneg %p2489_p10 }
  0xa7   : > { %p1688_p5 = pnand %p1686_p9, %p2490_p6 }
  0xa9   : > { %p1689_p1 = pneg %p1688_p5 }
  0xab   : > { %p1696_p11 = pnand %p1695_p3, %p1689_p1 }
  0xad   : > { %1699 = shalt.err (!%p1696_p11)
}
  0xae   : > { %s1700_s11 = scalar_lea.vmem %s2196_s6, 1024  ;;  %p2491_p7 = pmov %p2490_p6 }
  0xaf   : > { %p1701_p12 = scmp.ne.s32.totalorder %s2196_s6, %s1700_s11  ;;  %s1887_s28 = smov [#allocation13]  }
  0xb0   : > { %s1705_s21 = sshll.u32 %s1887_s28, 4  ;;  %s1706_s21 = int_to_ptr.vmem [resolvable:$false] %s1705_s21 }
  0xb1   : > { %p1703_p9 = pnand %p1701_p12, %p2491_p7  ;;  %s1707_s3 = scalar_lea.vmem %s1706_s21, 2048 }
  0xb2   : > { %p1708_p5 = scmp.lt.s32.totalorder %s2196_s6, %s1706_s21  ;;  %p1709_p2 = scmp.lt.s32.totalorder %s1707_s3, %s1700_s11 }
  0xb3   : > { %p1704_p6 = pneg %p1703_p9 }
  0xb4   : > { %p1710_p8 = por %p1709_p2, %p1708_p5 }
  0xb6   : > { %p1711_p0 = pnand %p1710_p8, %p1704_p6 }
  0xb8   : > { %1714 = shalt.err (!%p1711_p0)
}
  0xb9   : > { %1437 = dma.hbm_to_vmem [thread:$0]  (!%p2489_p10), %s2117_s23, 1024, %s2196_s6, %s2081_s22, %s1883_s29, %s1883_s29, %s1884_s8  }
  0xba   : > { %s2492_s20 = sld [smem:[#allocation27_spill]] }
  0xc0   : > { %p2493_p1 = scmp.ne.s32.totalorder %s2492_s20, 0 }
  0xc1   : > { %s2255_s17 = sand.u32 (!%p2493_p1), 1, %s1853_s9  }
  0xc2   : > { %368 = sbr.rel (%p2493_p1) target bundleno = 1306 (0x51a), region = 48  ;;  %s1280_s1 = sshll.u32 (!%p2493_p1), %s2255_s17, 2 }
  0xc3   : > { %s371_s24 = scalar_lea.sflag (!%p2493_p1), [#allocation6], %s2255_s17  ;;  %s2259_s26 = scalar_lea.vmem (!%p2493_p1), [#allocation5], %s1280_s1 }
  0xc9   : > { %1816 = dma.done.wait (%p2163_p13), %s371_s24, 64  }
  0xca   : > { %1818 = vsyncadd (%p2163_p13), %s371_s24, 4294967232  ;;  %p2494_p10 = scmp.eq.s32.totalorder %s1993_s16, 0 }
  0xcc   : > { %1820 = dma.done.wait (%p2494_p10), [#allocation9], 2176   ;;  %p2495_p4 = pmov %p2494_p10 }
  0xcd   : > { %s2496_s22 = sld [smem:[#allocation22_spill]]  ;;  %s2497_s29 = sld [smem:[#allocation26_spill]] }
  0xce   : > { %1822 = vsyncadd (%p2495_p4), [#allocation9], 4294965120  ;;  %s387_s8 = sand.u32 1, %s1993_s16  }
  0xcf   : > { %s388_s12 = scalar_lea.sflag [#allocation12], %s387_s8 }
  0xd3   : > { %s389_s23 = sand.u32 1, %s2496_s22   ;;  %p2498_p3 = scmp.ne.s32.totalorder %s2497_s29, 0 }
  0xd4   : > { %s1283_s6 = sshll.u32 %s389_s23, 6 }
  0xd5   : > { %s2271_s27 = scalar_lea.vmem [#allocation11], %s1283_s6 }
  0xd6   : > { %1824 = dma.done.wait (%p2498_p3), %s388_s12, 2048  }
  0xd7   : > { %1826 = vsyncadd (%p2498_p3), %s388_s12, 4294965248  ;;  %s1285_s4 = sshll.u32 %s2255_s17, 3  ;;  %s2278_s11 = scalar_lea.vmem [#allocation13], %s1283_s6 }
  0xd8   : > { %s2280_s28 = scalar_lea.vmem [#allocation14], %s1285_s4  ;;  %s2282_s21 = scalar_lea.vmem [#allocation15], %s1280_s1 }
  0xd9   : > { %s2499_s3 = sld [smem:[#allocation24_spill]] }
  0xdf   : > { %p1287_p13 = scmp.ne.s32.totalorder %s2499_s3, 0 }
  0xe0   : > { %v454_v0 = vld [vmem:[#allocation8] sm:$0xff] (!%p1287_p13)  ;;  %v455_v2 = vld [vmem:[#allocation8 + $0x8] sm:$0xff] (!%p1287_p13)  ;;  %v1888_v8 = vmov (!%p1287_p13), 0   ;;  %v456_v15 = vld [vmem:[#allocation8 + $0x10] sm:$0xff] (!%p1287_p13)  ;;  %vm592_vm0 = vcmask (!%p1287_p13), 261120   ;;  %v1889_v34 = vmov (!%p1287_p13), 0.0   ;;  %v472_v35 = vlaneseq (!%p1287_p13) }
  0xe1   : > { %452 = sbr.rel (%p1287_p13) target bundleno = 462 (0x1ce), region = 72  ;;  %v458_v1 = vld [vmem:[#allocation8 + $0x20] sm:$0xff] (!%p1287_p13)  ;;  %v459_v4 = vld [vmem:[#allocation8 + $0x28] sm:$0xff] (!%p1287_p13)  ;;  %628 = vmatprep.mubr.bf16.mxu0 (!%p1287_p13), %v1888_v8  ;;  %669 = vmatprep.mubr.bf16.mxu1 (!%p1287_p13), %v1888_v8  ;;  %v460_v16 = vld [vmem:[#allocation8 + $0x30] sm:$0xff] (!%p1287_p13)  ;;  %796 = vst [vmem:[#allocation3] sm:$0xff] (!%p1287_p13), %v1889_v34 }
  0xe2   : > { %v1289_v3 = vcombine.high (!%p1287_p13), %v454_v0, %v458_v1  ;;  %v1288_v5 = vcombine.low (!%p1287_p13), %v454_v0, %v458_v1  ;;  %v462_v6 = vld [vmem:[#allocation8 + $0x40] sm:$0xff] (!%p1287_p13)  ;;  %v1291_v9 = vcombine.high (!%p1287_p13), %v455_v2, %v459_v4  ;;  %v1290_v10 = vcombine.low (!%p1287_p13), %v455_v2, %v459_v4  ;;  %v463_v12 = vld [vmem:[#allocation8 + $0x48] sm:$0xff] (!%p1287_p13)  ;;  %v457_v17 = vld [vmem:[#allocation8 + $0x18] sm:$0xff] (!%p1287_p13)  ;;  %797 = vst [vmem:[#allocation4] sm:$0xff] (!%p1287_p13), %v1889_v34 }
  0xe3   : > { %v466_v7 = vld [vmem:[#allocation8 + $0x60] sm:$0xff] (!%p1287_p13)  ;;  %v467_v13 = vld [vmem:[#allocation8 + $0x68] sm:$0xff] (!%p1287_p13)  ;;  %v461_v19 = vld [vmem:[#allocation8 + $0x38] sm:$0xff] (!%p1287_p13)  ;;  %v1293_v21 = vcombine.high (!%p1287_p13), %v456_v15, %v460_v16  ;;  %v1292_v28 = vcombine.low (!%p1287_p13), %v456_v15, %v460_v16  ;;  %v473_v36 = vshrl.u32 (!%p1287_p13), %v472_v35, 7 }
  0xe4   : > { %v1297_v11 = vcombine.high (!%p1287_p13), %v462_v6, %v466_v7  ;;  %596 = vmatprep.subr.bf16.mxu0 (!%p1287_p13), %v1289_v3  ;;  %v1299_v14 = vcombine.high (!%p1287_p13), %v463_v12, %v467_v13  ;;  %637 = vmatprep.subr.bf16.mxu1 (!%p1287_p13), %v1291_v9  ;;  %v1296_v18 = vcombine.low (!%p1287_p13), %v462_v6, %v466_v7  ;;  %v464_v23 = vld [vmem:[#allocation8 + $0x50] sm:$0xff] (!%p1287_p13)  ;;  %v465_v25 = vld [vmem:[#allocation8 + $0x58] sm:$0xff] (!%p1287_p13)  ;;  %v470_v38 = vld [vmem:[#allocation10] sm:$0xff] (!%p1287_p13) }
  0xe5   : > { %597 = vmatpush1.bf16.msra.mxu0 (!%p1287_p13), %v1288_v5  ;;  %638 = vmatpush1.bf16.msra.mxu1 (!%p1287_p13), %v1290_v10  ;;  %v1298_v20 = vcombine.low (!%p1287_p13), %v463_v12, %v467_v13  ;;  %v1295_v22 = vcombine.high (!%p1287_p13), %v457_v17, %v461_v19  ;;  %v468_v24 = vld [vmem:[#allocation8 + $0x70] sm:$0xff] (!%p1287_p13)  ;;  %v469_v26 = vld [vmem:[#allocation8 + $0x78] sm:$0xff] (!%p1287_p13)  ;;  %v1294_v29 = vcombine.low (!%p1287_p13), %v457_v17, %v461_v19  ;;  %v474_v37 = vsub.s32 (!%p1287_p13), 0, %v473_v36 }
  0xe6   : > { %598 = vmatprep.subr.bf16.mxu0 (!%p1287_p13), %v1297_v11  ;;  %639 = vmatprep.subr.bf16.mxu1 (!%p1287_p13), %v1299_v14  ;;  %v453_v27 = vld [vmem:[%s2259_s26] sm:$0xf] (!%p1287_p13)  ;;  %v1301_v30 = vcombine.high (!%p1287_p13), %v464_v23, %v468_v24  ;;  %v1303_v31 = vcombine.high (!%p1287_p13), %v465_v25, %v469_v26  ;;  %v1300_v32 = vcombine.low (!%p1287_p13), %v464_v23, %v468_v24  ;;  %v482_v39 = vsub.s32 (!%p1287_p13), 2, %v473_v36 }
  0xe7   : > { %v1302_v33 = vcombine.low (!%p1287_p13), %v465_v25, %v469_v26  ;;  %v478_v40 = vsub.s32 (!%p1287_p13), 1, %v473_v36  ;;  %v486_v41 = vsub.s32 (!%p1287_p13), 3, %v473_v36  ;;  %v475_v42 = vrot.slane (!%p1287_p13), %v470_v38, %v474_v37 }
  0xe8   : > { %v483_v43 = vrot.slane %v470_v38, %v482_v39  ;;  %v490_v50 = vsub.s32 4, %v473_v36  ;;  %v498_v55 = vsub.s32 6, %v473_v36  ;;  %v494_v56 = vsub.s32 5, %v473_v36 }
  0xe9   : > { %599 = vmatpush1.bf16.msra.mxu0 %v1296_v18  ;;  %640 = vmatpush1.bf16.msra.mxu1 %v1298_v20  ;;  %v479_v44 = vrot.slane %v470_v38, %v478_v40  ;;  %v487_v45 = vrot.slane %v470_v38, %v486_v41  ;;  %v502_v60 = vsub.s32 7, %v473_v36 }
  0xea   : > { %678 = vmatprep.subr.bf16.mxu0 %v1293_v21  ;;  %719 = vmatprep.subr.bf16.mxu1 %v1295_v22  ;;  %v491_v0 = vrot.slane %v470_v38, %v490_v50  ;;  %v499_v1 = vrot.slane %v470_v38, %v498_v55  ;;  %v495_v2 = vrot.slane %v470_v38, %v494_v56 }
  0xeb   : > { %v503_v3 = vrot.slane %v470_v38, %v502_v60 }
  0xec   : > { %1304 = vmatmul.mubr.msk.bf16.vlgmr.msra.gmra.mrb[0].mxu0 %vm592_vm0, %v453_v27  ;;  %1305 = vmatmul.mubr.msk.bf16.vlgmr.msra.gmra.mrb[0].mxu1 %vm592_vm0, %v453_v27 }
  0xed   : > { %679 = vmatpush1.bf16.msra.mxu0 %v1292_v28  ;;  %720 = vmatpush1.bf16.msra.mxu1 %v1294_v29 }
  0xee   : > { %680 = vmatprep.subr.bf16.mxu0 %v1301_v30  ;;  %721 = vmatprep.subr.bf16.mxu1 %v1303_v31 }
  0xef   : > { %710 = vmatprep.mubr.bf16.mxu0 %v1888_v8  ;;  %751 = vmatprep.mubr.bf16.mxu1 %v1888_v8 }
  0xf1   : > { %681 = vmatpush1.bf16.msra.mxu0 %v1300_v32  ;;  %722 = vmatpush1.bf16.msra.mxu1 %v1302_v33 }
  0xf4   : > { %1306 = vmatmul.mubr.msk.bf16.vlgmr.msra.gmra.mrb[4].mxu0 %vm592_vm0, %v453_v27  ;;  %1307 = vmatmul.mubr.msk.bf16.vlgmr.msra.gmra.mrb[4].mxu1 %vm592_vm0, %v453_v27 }
 0x1bf   : > { %v630_v46 = vpop.f32.mrb[0].mxu0  ;;  %v671_v48 = vpop.f32.mrb[0].mxu1 }
 0x1c0   : > { %v631_v47 = vadd.f32 %v630_v46, %v475_v42  ;;  %v632_v49 = vpop.f32.mrb[1].mxu0  ;;  %v672_v51 = vadd.f32 %v671_v48, %v483_v43  ;;  %v673_v53 = vpop.f32.mrb[1].mxu1 }
 0x1c1   : > { %v633_v52 = vadd.f32 %v632_v49, %v479_v44  ;;  %v634_v54 = vpop.f32.mrb[2].mxu0  ;;  %v674_v57 = vadd.f32 %v673_v53, %v487_v45  ;;  %v675_v58 = vpop.f32.mrb[2].mxu1 }
 0x1c2   : > { %v635_v59 = vpop.f32.mrb[3].mxu0  ;;  %v676_v62 = vpop.f32.mrb[3].mxu1 }
 0x1c3   : > { %v1341_v61 = vpack.c.bf16 %v633_v52, %v631_v47  ;;  %v1342_v63 = vpack.c.bf16 %v674_v57, %v672_v51 }
 0x1c5   : > { %792 = vst [vmem:[#allocation2] sm:$0xff] %v1341_v61  ;;  %793 = vst [vmem:[#allocation2 + $0x8] sm:$0xff] %v1342_v63 }
 0x1c7   : > { %v712_v4 = vpop.f32.mrb[4].mxu0  ;;  %v753_v6 = vpop.f32.mrb[4].mxu1 }
 0x1c8   : > { %v713_v5 = vadd.f32 %v712_v4, %v491_v0  ;;  %v714_v7 = vpop.f32.mrb[5].mxu0  ;;  %v754_v8 = vadd.f32 %v753_v6, %v499_v1  ;;  %v755_v10 = vpop.f32.mrb[5].mxu1 }
 0x1c9   : > { %v715_v9 = vadd.f32 %v714_v7, %v495_v2  ;;  %v716_v11 = vpop.f32.mrb[6].mxu0  ;;  %v756_v12 = vadd.f32 %v755_v10, %v503_v3  ;;  %v757_v13 = vpop.f32.mrb[6].mxu1 }
 0x1ca   : > { %v717_v14 = vpop.f32.mrb[7].mxu0  ;;  %v758_v16 = vpop.f32.mrb[7].mxu1 }
 0x1cb   : > { %v1343_v15 = vpack.c.bf16 %v715_v9, %v713_v5  ;;  %v1344_v17 = vpack.c.bf16 %v756_v12, %v754_v8 }
 0x1cd   : > { %794 = vst [vmem:[#allocation2 + $0x10] sm:$0xff] %v1343_v15  ;;  %795 = vst [vmem:[#allocation2 + $0x18] sm:$0xff] %v1344_v17 }
 0x1ce PF: > { %v1549_v18 = vld [vmem:[%s2271_s27] sm:$0xff]   ;;  %v1890_v19 = vmov 0.0   ;;  %v1550_v20 = vld [vmem:[%s2271_s27 + $0x8] sm:$0xff]   ;;  %s2500_s16 = sld [smem:[#allocation24_spill]]  ;;  %vm1891_vm1 = vmmov 0   ;;  %v1551_v21 = vld [vmem:[%s2271_s27 + $0x10] sm:$0xff]  }
 0x1cf   : > { %1363 = vmatprep.subr.bf16.mxu0 %v1890_v19  ;;  %1383 = vmatprep.subr.bf16.mxu1 %v1890_v19  ;;  %v1552_v22 = vld [vmem:[%s2271_s27 + $0x18] sm:$0xff]   ;;  %v1553_v23 = vld [vmem:[%s2271_s27 + $0x20] sm:$0xff]   ;;  %v1554_v24 = vld [vmem:[%s2271_s27 + $0x28] sm:$0xff]   ;;  %s2501_s8 = sld [smem:[#allocation33_spill]] }
 0x1d0   : > { %1364 = vmatpush3.bf16.msra.mxu0 %v1549_v18  ;;  %1379 = vmatprep.mubr.msk.bf16.mxu0 %vm1891_vm1, %v1890_v19  ;;  %v1555_v25 = vld [vmem:[%s2271_s27 + $0x30] sm:$0xff]   ;;  %v1556_v26 = vld [vmem:[%s2271_s27 + $0x38] sm:$0xff]   ;;  %v1557_v34 = vld [vmem:[%s2278_s11] sm:$0xff]  }
 0x1d1   : > { %1365 = vmatprep.subr.bf16.mxu0 %v1890_v19  ;;  %1399 = vmatprep.mubr.msk.bf16.mxu1 %vm1891_vm1, %v1890_v19  ;;  %v1558_v35 = vld [vmem:[%s2278_s11 + $0x8] sm:$0xff]   ;;  %v1559_v36 = vld [vmem:[%s2278_s11 + $0x10] sm:$0xff]   ;;  %v1560_v41 = vld [vmem:[%s2278_s11 + $0x18] sm:$0xff]  }
 0x1d2   : > { %1384 = vmatpush3.bf16.msra.mxu1 %v1557_v34  ;;  %v1561_v42 = vld [vmem:[%s2278_s11 + $0x20] sm:$0xff]   ;;  %v1562_v43 = vld [vmem:[%s2278_s11 + $0x28] sm:$0xff]   ;;  %v1563_v44 = vld [vmem:[%s2278_s11 + $0x30] sm:$0xff]  }
 0x1d3   : > { %1385 = vmatprep.subr.bf16.mxu1 %v1890_v19  ;;  %v1564_v45 = vld [vmem:[%s2278_s11 + $0x38] sm:$0xff]   ;;  %v927_v51 = vld [vmem:[#allocation4] sm:$0xff]  ;;  %v930_v55 = vld [vmem:[#allocation3] sm:$0xff] }
 0x1d4   : > { %1366 = vmatpush3.bf16.msra.mxu0 %v1550_v20  ;;  %s1312_s20 = sshll.u32 %s2500_s16, 7  ;;  %p1331_p11 = scmp.ne.s32.totalorder %s2500_s16, 7 }
 0x1d5   : > { %1367 = vmatprep.subr.bf16.mxu0 %v1890_v19  ;;  %s799_s1 = sshra.s32 %s1312_s20, 7  ;;  %v1314_v28 = vld [vmem:[%s2501_s8] ss:$0 sm:$0xff]  ;;  %s2502_s12 = sld [smem:[#allocation34_spill]] (!%p1331_p11) }
 0x1d6   : > { %s1313_s24 = sshll.u32 %s799_s1, 2  ;;  %1386 = vmatpush3.bf16.msra.mxu1 %v1558_v35 }
 0x1d7   : > { %s802_s26 = scalar_lea.vmem [#allocation2], %s1313_s24  ;;  %1387 = vmatprep.subr.bf16.mxu1 %v1890_v19 }
 0x1d8   : > { %1368 = vmatpush3.bf16.msra.mxu0 %v1551_v21  ;;  %v803_v27 = vld [vmem:[%s802_s26] sm:$0xf] }
 0x1d9   : > { %1369 = vmatprep.subr.bf16.mxu0 %v1890_v19 }
 0x1da   : > { %1388 = vmatpush3.bf16.msra.mxu1 %v1559_v36 }
 0x1db   : > { %1389 = vmatprep.subr.bf16.mxu1 %v1890_v19  ;;  %v1332_v62 = vld [vmem:[%s2502_s12] ss:$0 sm:$0xff] (!%p1331_p11) }
 0x1dc   : > { %1370 = vmatpush3.bf16.msra.mxu0 %v1552_v22 }
 0x1dd   : > { %1371 = vmatprep.subr.bf16.mxu0 %v1890_v19 }
 0x1de   : > { %1390 = vmatpush3.bf16.msra.mxu1 %v1560_v41 }
 0x1df   : > { %1391 = vmatprep.subr.bf16.mxu1 %v1890_v19 }
 0x1e0   : > { %1372 = vmatpush3.bf16.msra.mxu0 %v1553_v23 }
 0x1e1   : > { %1373 = vmatprep.subr.bf16.mxu0 %v1890_v19 }
 0x1e2   : > { %1392 = vmatpush3.bf16.msra.mxu1 %v1561_v42 }
 0x1e3   : > { %1393 = vmatprep.subr.bf16.mxu1 %v1890_v19 }
 0x1e4   : > { %1374 = vmatpush3.bf16.msra.mxu0 %v1554_v24 }
 0x1e5   : > { %1375 = vmatprep.subr.bf16.mxu0 %v1890_v19 }
 0x1e6   : > { %1394 = vmatpush3.bf16.msra.mxu1 %v1562_v43 }
 0x1e7   : > { %1395 = vmatprep.subr.bf16.mxu1 %v1890_v19 }
 0x1e8   : > { %1376 = vmatpush3.bf16.msra.mxu0 %v1555_v25 }
 0x1e9   : > { %1377 = vmatprep.subr.bf16.mxu0 %v1890_v19 }
 0x1ea   : > { %1396 = vmatpush3.bf16.msra.mxu1 %v1563_v44 }
 0x1eb   : > { %1397 = vmatprep.subr.bf16.mxu1 %v1890_v19 }
 0x1ec   : > { %1378 = vmatpush3.bf16.msra.mxu0 %v1556_v26 }
 0x1ee   : > { %1398 = vmatpush3.bf16.msra.mxu1 %v1564_v45 }
 0x1ef   : > { %1380 = vmatmul.mubr.bf16.vlgmr.msra.gmra.mrb[0].mxu0 %v803_v27 }
 0x2c2   : > { %v909_v29 = vpop.f32.mrb[0].mxu0 }
 0x2c3   : > { %v910_v30 = vadd.f32 %v1314_v28, %v909_v29  ;;  %v1381_v31 = vpop.f32.mrb[1].mxu0 }
 0x2c4   : > { %v912_v32 = vpop.f32.mrb[2].mxu0 }
 0x2c5   : > { %915 = vmax.xlane.f32.xlu0 %v910_v30  ;;  %v1382_v33 = vpop.f32.mrb[3].mxu0 }
 0x352   : > { %v916_v37 = vpop.xlane.xlu0 %915 }
 0x353   : > { %v917_v38 = vsub.f32 %v910_v30, %v916_v37 }
 0x355   : > { %v918_v39 = vmul.f32 1.442695, %v917_v38 }
 0x357   : > { %1565 = vpow2.f32 %v918_v39 }
 0x361   : > { %v1566_v40 = vpop.eup %1565 }
 0x362   : > { %920 = vadd.xlane.f32.xlu0 %v1566_v40 }
 0x3ef   : > { %v921_v46 = vpop.xlane.xlu0 %920 }
 0x3f0   : > { %1567 = vrcp.f32 %v921_v46 }
 0x3fa   : > { %v1568_v47 = vpop.eup %1567 }
 0x3fb   : > { %v923_v48 = vmul.f32 %v1568_v47, %v921_v46 }
 0x3fd   : > { %v924_v49 = vsub.f32 2.0, %v923_v48 }
 0x3ff   : > { %v925_v50 = vmul.f32 %v1568_v47, %v924_v49 }
 0x401   : > { %v926_v52 = vmul.f32 %v1566_v40, %v925_v50 }
 0x403   : > { %v928_v53 = vadd.f32 %v927_v51, %v926_v52  ;;  %v931_v54 = vpack.c.bf16 %v926_v52, %v926_v52 }
 0x405   : > { %929 = vst [vmem:[#allocation4] sm:$0xff] %v928_v53  ;;  %1400 = vmatmul.mubr.bf16.vlgmr.msra.gmra.mrb[0].mxu1 %v931_v54 }
 0x40c   : > { %v1052_v63 = vld [vmem:[#allocation4] sm:$0xff] (!%p1331_p11) }
 0x40d   : > { %v1053_v1 = vmul.f32 (!%p1331_p11), 0.125, %v1052_v63 }
 0x40f   : > { %v1054_v2 = vpack.c.bf16 (!%p1331_p11), %v1053_v1, %v1053_v1 }
 0x411   : > { %1055 = vst [vmem:[%s2282_s21] sm:$0xf] (!%p1331_p11), %v1054_v2 }
 0x4d5   : > { %1041 = sbr.rel (%p1331_p11) target bundleno = 1254 (0x4e6), region = 76 }
 0x4d8   : > { %v1030_v56 = vpop.f32.mrb[0].mxu1 }
 0x4d9   : > { %v1036_v57 = vadd.f32 %v1030_v56, %v930_v55  ;;  %v1401_v58 = vpop.f32.mrb[1].mxu1 }
 0x4da   : > { %v1033_v59 = vpop.f32.mrb[2].mxu1 }
 0x4db   : > { %1037 = vst [vmem:[#allocation3] sm:$0xff] %v1036_v57  ;;  %v1402_v60 = vpop.f32.mrb[3].mxu1 }
 0x4e2   : > { %v1042_v61 = vld [vmem:[#allocation3] sm:$0xff] }
 0x4e3   : > { %v1050_v0 = vadd.f32 %v1332_v62, %v1042_v61 }
 0x4e5   : > { %1051 = vst [vmem:[%s2280_s28] sm:$0xff] %v1050_v0 }
 0x4e6 PF: > { %s2503_s27 = sld [smem:[#allocation25_spill]]  ;;  %s2504_s16 = sld [smem:[#allocation35_spill]] }
 0x4e7   : > { %s1075_s1 = sshll.u32 %s2280_s28, 4  ;;  %s1057_s24 = scalar_lea.sflag [#allocation7], %s2255_s17  ;;  %s1076_s1 = int_to_ptr.vmem [resolvable:$true] %s1075_s1 }
 0x4e8   : > { %s1715_s26 = scalar_lea.vmem %s1076_s1, 128  ;;  %p2505_p7 = scmp.ne.s32.totalorder %s2484_s25, 0 }
 0x4e9   : > { %p1716_p12 = scmp.ne.s32.totalorder %s1076_s1, %s1715_s26  ;;  %s1892_s22 = smov [#allocation14]  }
 0x4ea   : > { %s1719_s29 = sshll.u32 %s1892_s22, 4  ;;  %s1720_s29 = int_to_ptr.vmem [resolvable:$false] %s1719_s29 }
 0x4eb   : > { %p1717_p9 = pnand %p1716_p12, %p2505_p7  ;;  %s1721_s8 = scalar_lea.vmem %s1720_s29, 256 }
 0x4ec   : > { %s1335_s4 = sshll.u32 %s2503_s27, 7  ;;  %p1722_p5 = scmp.lt.s32.totalorder %s1076_s1, %s1720_s29 }
 0x4ed   : > { %s2338_s20 = scalar_lea.hbm %s2504_s16, %s1335_s4  ;;  %p1718_p6 = pneg %p1717_p9 }
 0x4ee   : > { %p1723_p2 = scmp.lt.s32.totalorder %s1721_s8, %s1715_s26 }
 0x4f0   : > { %p1724_p8 = por %p1723_p2, %p1722_p5 }
 0x4f2   : > { %p1725_p0 = pnand %p1724_p8, %p1718_p6 }
 0x4f4   : > { %1728 = shalt.err (!%p1725_p0)
}
 0x4f5   : > { %s1729_s28 = scalar_lea.hbm %s2338_s20, 128  ;;  %s1733_s12 = scalar_lea.hbm %s2504_s16, 256 }
 0x4f6   : > { %p1730_p1 = scmp.ne.s32.totalorder %s2338_s20, %s1729_s28  ;;  %p1734_p3 = scmp.lt.u32.totalorder %s2338_s20, %s2504_s16 }
 0x4f7   : > { %p1735_p13 = scmp.lt.u32.totalorder %s1733_s12, %s1729_s28  ;;  %p1737_p12 = scmp.lt.u32.totalorder %s1729_s28, %s2338_s20 }
 0x4f8   : > { %p1731_p10 = pnand %p1730_p1, %p2505_p7 }
 0x4f9   : > { %p1736_p11 = por %p1735_p13, %p1734_p3 }
 0x4fa   : > { %p1732_p4 = pneg %p1731_p10 }
 0x4fb   : > { %p1738_p9 = por %p1737_p12, %p1736_p11 }
 0x4fd   : > { %p1739_p6 = pnand %p1738_p9, %p1732_p4 }
 0x4ff   : > { %1742 = shalt.err (!%p1739_p6)
}
 0x500   : > { %1417 = dma.vmem_to_hbm [thread:$0]  (%p2505_p7), %s1076_s1, 128, %s2338_s20, %s1057_s24  }
 0x501   : > { %s1336_s3 = sshll.u32 %s2503_s27, 6  ;;  %s1088_s26 = sshll.u32 %s2282_s21, 4  ;;  %s1089_s26 = int_to_ptr.vmem [resolvable:$true] %s1088_s26 }
 0x502   : > { %s2506_s8 = sld [smem:[#allocation36_spill]]  ;;  %s1062_s28 = scalar_lea.sflag [#allocation16], %s2255_s17 }
 0x503   : > { %s1743_s6 = scalar_lea.vmem %s1089_s26, 64  ;;  %s1893_s12 = smov [#allocation15]  }
 0x504   : > { %p1744_p5 = scmp.ne.s32.totalorder %s1089_s26, %s1743_s6  ;;  %s1747_s4 = sshll.u32 %s1893_s12, 4  ;;  %s1748_s4 = int_to_ptr.vmem [resolvable:$false] %s1747_s4 }
 0x505   : > { %s1749_s11 = scalar_lea.vmem %s1748_s4, 128  ;;  %p1750_p0 = scmp.lt.s32.totalorder %s1089_s26, %s1748_s4 }
 0x506   : > { %p1745_p2 = pnand %p1744_p5, %p2505_p7  ;;  %p1751_p1 = scmp.lt.s32.totalorder %s1749_s11, %s1743_s6 }
 0x508   : > { %s2364_s23 = scalar_lea.hbm %s2506_s8, %s1336_s3  ;;  %p1746_p8 = pneg %p1745_p2 }
 0x509   : > { %p1752_p10 = por %p1751_p1, %p1750_p0 }
 0x50b   : > { %p1753_p4 = pnand %p1752_p10, %p1746_p8 }
 0x50d   : > { %1756 = shalt.err (!%p1753_p4)
}
 0x50e   : > { %s1757_s17 = scalar_lea.hbm %s2364_s23, 64  ;;  %s1761_s20 = scalar_lea.hbm %s2506_s8, 128 }
 0x50f   : > { %p1758_p3 = scmp.ne.s32.totalorder %s2364_s23, %s1757_s17  ;;  %p1762_p12 = scmp.lt.u32.totalorder %s2364_s23, %s2506_s8 }
 0x510   : > { %p1763_p9 = scmp.lt.u32.totalorder %s1761_s20, %s1757_s17  ;;  %p1765_p5 = scmp.lt.u32.totalorder %s1757_s17, %s2364_s23 }
 0x511   : > { %p1759_p13 = pnand %p1758_p3, %p2505_p7 }
 0x512   : > { %p1764_p6 = por %p1763_p9, %p1762_p12 }
 0x513   : > { %p1760_p11 = pneg %p1759_p13 }
 0x514   : > { %p1766_p2 = por %p1765_p5, %p1764_p6 }
 0x516   : > { %p1767_p8 = pnand %p1766_p2, %p1760_p11 }
 0x518   : > { %1770 = shalt.err (!%p1767_p8)
}
 0x519   : > { %1418 = dma.vmem_to_hbm [thread:$0]  (%p2505_p7), %s1089_s26, 64, %s2364_s23, %s1062_s28  }
 0x51a PF: > { %p1450_p0 = scmp.ge.s32.totalorder %s1877_s15, 2  ;;  %s1100_s3 = sand.u32 1, %s1849_s30  }
 0x51b   : > { %p2507_p1 = scmp.ne.s32.totalorder %s2485_s7, 0  ;;  %s1101_s22 = scalar_lea.sflag [#allocation7], %s1100_s3 }
 0x51d   : > { %p1439_p10 = pnand %p1450_p0, %p2507_p1 }
 0x51f   : > { %1828 = dma.done.wait (!%p1439_p10), %s1101_s22, 128  }
 0x520   : > { %1830 = vsyncadd (!%p1439_p10), %s1101_s22, 4294967168  ;;  %s1110_s29 = scalar_lea.sflag [#allocation16], %s1100_s3 }
 0x521   : > { %1832 = dma.done.wait (!%p1439_p10), %s1110_s29, 64  }
 0x522   : > { %1834 = vsyncadd (!%p1439_p10), %s1110_s29, 4294967232  ;;  %s32_s15 = sadd.s32 1, %s1877_s15   ;;  %s2508_s27 = sld [smem:[#allocation22_spill]] }
 0x523   : > { %p29_p4 = scmp.ge.s32.totalorder %s32_s15, 18   ;;  %s2509_s28 = sld [smem:[#allocation23_spill]] }
 0x524   : > { %s2510_s29 = sld [smem:[#allocation29_spill]]  ;;  %s2511_s25 = sld [smem:[#allocation28_spill]] }
 0x525   : > { %s2512_s30 = smov %s1853_s9  ;;  %s2513_s9 = smov %s1857_s10 }
 0x526   : > { %s2514_s10 = smov %s2179_s19  ;;  %s2515_s11 = smov %s1869_s13 }
 0x527   : > { %s2516_s12 = smov %s1873_s14  ;;  %s2518_s14 = smov %s2524_s18 }
 0x528   :  { %31 = sbr.rel (!%p29_p4) target bundleno = 21 (0x15), region = 151 }
 0x52a   : > { %s2517_s13 = smov %s2511_s25 }
 0x52f   :  { %1115 = vsyncpa [#allocation6], 1 }
 0x530   :  { %1117 = vsyncpa [#allocation6 + $0x1], 1 }
 0x531   :  { %1118 = vsyncpa [#allocation9], 1 }
 0x532   :  { %1119 = vsyncpa [#allocation12], 1 }
 0x533   :  { %1121 = vsyncpa [#allocation12 + $0x1], 1 }
 0x534   :  { %1122 = vsyncpa [#allocation7], 1 }
 0x535   :  { %1124 = vsyncpa [#allocation7 + $0x1], 1 }
 0x536   :  { %1125 = vsyncpa [#allocation16], 1 }
 0x537   :  { %1127 = vsyncpa [#allocation16 + $0x1], 1 }

// kernel: tpu_custom_call.1
= control target key start
LH: loop header
LB: loop body
LE: loop exit
PB: predicated region body
PF: predicated region fallthrough
CT: control target
= control target key end

     0   :  { %s2421_s0 = inlined_call_operand.hbm [shape: bf16[16,32], index: 0, kind: input, shape index: {}]   ;;  %s2422_s1 = inlined_call_operand.hbm [shape: bf16[32,1024], index: 1, kind: input, shape index: {}]   ;;  %s2423_s2 = inlined_call_operand.hbm [shape: f32[1,1024], index: 2, kind: input, shape index: {}]   ;;  %s2424_s3 = inlined_call_operand.hbm [shape: bf16[8,128,128], index: 3, kind: input, shape index: {}]   ;;  %s2425_s4 = inlined_call_operand.vmem [shape: f32[1,128], index: 4, kind: input, shape index: {}]   ;;  %s2426_s5 = inlined_call_operand.hbm [shape: bf16[8,128,128], index: 5, kind: input, shape index: {}]   ;;  %s2427_s6 = inlined_call_operand.vmem [shape: f32[1,128], index: 6, kind: input, shape index: {}]   ;;  %s2428_s7 = inlined_call_operand.hbm [shape: f32[16,128], index: 7, kind: output, shape index: {0}]   ;;  %s2429_s8 = inlined_call_operand.hbm [shape: bf16[16,128], index: 8, kind: output, shape index: {1}]  }
   0x1   :  { %2454 = sst [smem:[#allocation31_spill]] %s2422_s1 }
   0x2   :  { %2455 = sst [smem:[#allocation32_spill]] %s2424_s3 }
   0x3   :  { %2456 = sst [smem:[#allocation33_spill]] %s2425_s4 }
   0x4   :  { %2457 = sst [smem:[#allocation34_spill]] %s2427_s6 }
   0x5   :  { %2458 = sst [smem:[#allocation35_spill]] %s2428_s7 }
   0x6   :  { %2459 = sst [smem:[#allocation36_spill]] %s2429_s8 }
   0x7   :  { %14 = vsyncpa [#allocation6], 0 }
   0x8   :  { %16 = vsyncpa [#allocation6 + $0x1], 0 }
   0x9   :  { %17 = vsyncpa [#allocation9], 0 }
   0xa   :  { %18 = vsyncpa [#allocation12], 0 }
   0xb   :  { %20 = vsyncpa [#allocation12 + $0x1], 0 }
   0xc   :  { %21 = vsyncpa [#allocation7], 0 }
   0xd   :  { %23 = vsyncpa [#allocation7 + $0x1], 0 }
   0xe   :  { %24 = vsyncpa [#allocation16], 0 }
   0xf   :  { %26 = vsyncpa [#allocation16 + $0x1], 0  ;;  %s1939_s27 = smov 0   ;;  %s1941_s28 = smov 0  }
  0x10   :  { %s1943_s29 = smov 0   ;;  %s1945_s30 = smov 0  }
  0x11   :  { %s1947_s9 = smov 0   ;;  %s1949_s10 = smov 0  }
  0x12   :  { %s1951_s11 = smov 0   ;;  %s1953_s12 = smov 0  }
  0x13   :  { %s1955_s13 = smov 0   ;;  %s1957_s14 = smov 0  }
  0x14   :  { %s1959_s15 = smov 0  }
  0x15 LB: > { %2460 = sst [smem:[#allocation22_spill]] %s1841_s28  ;;  %s1993_s16 = sadd.s32 4294967295, %s1877_s15   ;;  %s1877_s15 = sphi %s1959_s15, %s32_s15   ;;  %s1873_s14 = sphi %s1957_s14, %s2518_s14   ;;  %s1869_s13 = sphi %s1955_s13, %s2517_s13   ;;  %s1865_s12 = sphi %s1953_s12, %s2516_s12   ;;  %s1861_s11 = sphi %s1951_s11, %s2515_s11   ;;  %s1857_s10 = sphi %s1949_s10, %s2514_s10   ;;  %s1853_s9 = sphi %s1947_s9, %s2513_s9   ;;  %s1849_s30 = sphi %s1945_s30, %s2512_s30   ;;  %s1845_s29 = sphi %s1943_s29, %s2510_s29   ;;  %s1841_s28 = sphi %s1941_s28, %s2509_s28   ;;  %s1837_s27 = sphi %s1939_s27, %s2508_s27  }
  0x16   : > { %2461 = sst [smem:[#allocation23_spill]] %s1845_s29  ;;  %p132_p0 = scmp.ne.s32.totalorder %s1841_s28, %s1837_s27 }
  0x17   : > { %2462 = sst [smem:[#allocation24_spill]] %s1861_s11  ;;  %p2432_p1 = scmp.eq.s32.totalorder %s1993_s16, 0 }
  0x18   : > { %2463 = sst [smem:[#allocation25_spill]] %s1865_s12  ;;  %p1267_p2 = scmp.ge.s32.totalorder %s1877_s15, 1 }
  0x19   : > { %p263_p3 = scmp.lt.s32.totalorder %s1877_s15, 17  ;;  %p2001_p4 = por %p132_p0, %p2432_p1 }
  0x1a   : > { %s1879_s19 = smov [#allocation8]   ;;  %s41_s22 = sadd.s32 1, %s1869_s13 }
  0x1b   : > { %s2464_s17 = scalar_select %p2001_p4, 1, 0 }
  0x1c   : > { %p2005_p5 = pnand %p1267_p2, %p263_p3  ;;  %s275_s20 = sshll.u32 %s1879_s19, 4  ;;  %s276_s20 = int_to_ptr.vmem [resolvable:$true] %s275_s20 }
  0x1d   : > { %2465 = sst [smem:[#allocation26_spill]] %s2464_s17  ;;  %s2469_s1 = sld [smem:[#allocation31_spill]] }
  0x1e   : > { %s2466_s18 = scalar_select %p2005_p5, 1, 0 }
  0x1f   : > { %p1421_p6 = pneg %p2005_p5 }
  0x20   : > { %2467 = sst [smem:[#allocation27_spill]] %s2466_s18 }
  0x21   : > { %p2013_p7 = pnand %p1421_p6, %p2432_p1 }
  0x23   : > { %s1569_s25 = scalar_lea.hbm %s2469_s1, 2048  ;;  %p2441_p9 = pneg %p2013_p7 }
  0x24   : > { %p1570_p8 = scmp.ne.s32.totalorder %s2469_s1, %s1569_s25  ;;  %p1576_p12 = scmp.lt.u32.totalorder %s1569_s25, %s2469_s1 }
  0x26   : > { %p1572_p10 = pnand %p2441_p9, %p1570_p8 }
  0x28   : > { %p1573_p11 = pneg %p1572_p10 }
  0x2a   : > { %p1578_p13 = pnand %p1576_p12, %p1573_p11 }
  0x2c   : > { %1581 = shalt.err (!%p1578_p13)
}
  0x2d   : > { %s1582_s7 = scalar_lea.vmem %s276_s20, 2048  ;;  %p1590_p6 = scmp.lt.s32.totalorder %s276_s20, %s276_s20 }
  0x2e   : > { %p1583_p0 = scmp.ne.s32.totalorder %s276_s20, %s1582_s7  ;;  %p1591_p1 = scmp.lt.s32.totalorder %s1582_s7, %s1582_s7 }
  0x30   : > { %p1585_p2 = pnand %p1583_p0, %p2441_p9  ;;  %p1592_p4 = por %p1591_p1, %p1590_p6 }
  0x32   : > { %p1586_p3 = pneg %p1585_p2 }
  0x34   : > { %p1593_p5 = pnand %p1592_p4, %p1586_p3 }
  0x36   : > { %1596 = shalt.err (!%p1593_p5)
}
  0x37   : > { %s1880_s23 = smov 512   ;;  %s1881_s8 = smov 32  }
  0x38   : > { %1424 = dma.hbm_to_vmem [thread:$0]  (!%p2013_p7), %s2469_s1, 2048, %s276_s20, [#allocation9], %s1880_s23, %s1880_s23, %s1881_s8  }
  0x39   : > { %p2040_p1 = scmp.ge.s32.totalorder %s41_s22, 8  ;;  %p2440_p4 = scmp.eq.s32.totalorder %s1877_s15, 0 }
  0x3a   : > { %s119_s26 = sadd.s32 1, %s1845_s29  ;;  %p126_p5 = scmp.ne.s32.totalorder %s1845_s29, %s1841_s28 }
  0x3b   : > { %s2470_s25 = scalar_select %p2040_p1, 1, 0 }
  0x3c   : > { %s2520_s22 = smov (%p2040_p1, %s41_s22), 0  ;;  %p128_p8 = por %p126_p5, %p2440_p4 }
  0x3d   : > { %2471 = sst [smem:[#allocation28_spill]] %s2520_s22  ;;  %p2439_p10 = scmp.lt.s32.totalorder %s1877_s15, 16 }
  0x3e   : > { %s116_s27 = ssub.s32 %s1869_s13, %s2520_s22  ;;  %s324_s19 = sand.u32 1, %s1877_s15  }
  0x3f   : > { %p117_p11 = scmp.eq.s32.totalorder %s116_s27, 0  ;;  %s326_s20 = sand.u32 1, %s1845_s29  }
  0x40   : > { %s2437_s23 = sshll.u32 %s1869_s13, 10  ;;  %s2063_s24 = sshll.u32 %s326_s20, 6 }
  0x41   : > { %s2061_s8 = scalar_select %p117_p11, %s1845_s29, %s119_s26  }
  0x42   : > { %s2473_s3 = sld [smem:[#allocation32_spill]]  ;;  %p2074_p12 = pnand %p2439_p10, %p128_p8 }
  0x43   : > { %2472 = sst [smem:[#allocation29_spill]] %s2061_s8  ;;  %s328_s26 = scalar_lea.vmem [#allocation11], %s2063_s24 }
  0x44   : > { %s2474_s27 = scalar_select %p2074_p12, 1, 0 }
  0x45   : > { %s335_s20 = sshll.u32 %s328_s26, 4  ;;  %s2081_s22 = scalar_lea.sflag [#allocation12], %s324_s19  ;;  %s2079_s20 = int_to_ptr.vmem [resolvable:$true] %s335_s20 }
  0x46   : > { %2475 = sst [smem:[#allocation30_spill]] %s2474_s27  ;;  %p2450_p0 = pneg %p2074_p12 }
  0x48   : > { %s2070_s12 = scalar_lea.hbm %s2473_s3, %s2437_s23  ;;  %s1602_s8 = scalar_lea.hbm %s2473_s3, 8192 }
  0x49   : > { %s1597_s1 = scalar_lea.hbm %s2070_s12, 1024  ;;  %p1603_p6 = scmp.lt.u32.totalorder %s2070_s12, %s2473_s3 }
  0x4a   : > { %p1598_p13 = scmp.ne.s32.totalorder %s2070_s12, %s1597_s1  ;;  %p1604_p5 = scmp.lt.u32.totalorder %s1602_s8, %s1597_s1 }
  0x4b   : > { %p1606_p11 = scmp.lt.u32.totalorder %s1597_s1, %s2070_s12 }
  0x4c   : > { %p1600_p2 = pnand %p2450_p0, %p1598_p13  ;;  %p1605_p8 = por %p1604_p5, %p1603_p6 }
  0x4e   : > { %p1601_p3 = pneg %p1600_p2  ;;  %p1607_p10 = por %p1606_p11, %p1605_p8 }
  0x50   : > { %p1608_p4 = pnand %p1607_p10, %p1601_p3 }
  0x52   : > { %1611 = shalt.err (!%p1608_p4)
}
  0x53   : > { %s1612_s19 = scalar_lea.vmem %s2079_s20, 1024  ;;  %s1882_s23 = smov [#allocation11]  }
  0x54   : > { %p1613_p13 = scmp.ne.s32.totalorder %s2079_s20, %s1612_s19  ;;  %s1617_s26 = sshll.u32 %s1882_s23, 4  ;;  %s1618_s26 = int_to_ptr.vmem [resolvable:$false] %s1617_s26 }
  0x55   : > { %s1619_s6 = scalar_lea.vmem %s1618_s26, 2048  ;;  %p1620_p1 = scmp.lt.s32.totalorder %s2079_s20, %s1618_s26 }
  0x56   : > { %p1615_p2 = pnand %p1613_p13, %p2450_p0  ;;  %p1621_p6 = scmp.lt.s32.totalorder %s1619_s6, %s1612_s19 }
  0x58   : > { %p1616_p9 = pneg %p1615_p2  ;;  %p1622_p5 = por %p1621_p6, %p1620_p1 }
  0x5a   : > { %p1623_p8 = pnand %p1622_p5, %p1616_p9 }
  0x5c   : > { %1626 = shalt.err (!%p1623_p8)
}
  0x5d   : > { %s1883_s29 = smov 64   ;;  %s1884_s8 = smov 4  }
  0x5e   : > { %1434 = dma.hbm_to_vmem [thread:$0]  (!%p2074_p12), %s2070_s12, 1024, %s2079_s20, %s2081_s22, %s1883_s29, %s1883_s29, %s1884_s8  }
  0x5f   : > { %s2476_s1 = sshll.u32 %s1869_s13, 10  ;;  %s349_s26 = scalar_lea.vmem [#allocation13], %s2063_s24 }
  0x60   : > { %s2117_s23 = scalar_lea.hbm %s2426_s5, %s2476_s1  ;;  %s2120_s6 = sshll.u32 %s349_s26, 4  ;;  %s2196_s6 = int_to_ptr.vmem [resolvable:$true] %s2120_s6 }
  0x61   : > { %s1885_s3 = smov [#allocation10]   ;;  %s1627_s28 = scalar_lea.hbm %s2423_s2, 128 }
  0x62   : > { %s289_s4 = sshll.u32 %s1885_s3, 4  ;;  %p1628_p9 = scmp.ne.s32.totalorder %s2423_s2, %s1627_s28  ;;  %s290_s4 = int_to_ptr.vmem [resolvable:$true] %s289_s4 }
  0x63   : > { %p2477_p1 = pneg %p2013_p7  ;;  %p1634_p3 = scmp.lt.u32.totalorder %s1627_s28, %s2423_s2 }
  0x65   : > { %p1630_p4 = pnand %p1628_p9, %p2477_p1 }
  0x67   : > { %p1631_p10 = pneg %p1630_p4 }
  0x69   : > { %p1636_p11 = pnand %p1634_p3, %p1631_p10 }
  0x6b   : > { %1639 = shalt.err (!%p1636_p11)
}
  0x6c   : > { %s1640_s3 = scalar_lea.vmem %s290_s4, 128  ;;  %p2478_p2 = pmov %p2477_p1 }
  0x6d   : > { %p1641_p13 = scmp.ne.s32.totalorder %s290_s4, %s1640_s3  ;;  %p1648_p8 = scmp.lt.s32.totalorder %s290_s4, %s290_s4 }
  0x6e   : > { %p1649_p0 = scmp.lt.s32.totalorder %s1640_s3, %s1640_s3 }
  0x6f   : > { %p1643_p6 = pnand %p1641_p13, %p2478_p2 }
  0x70   : > { %p1650_p12 = por %p1649_p0, %p1648_p8 }
  0x71   : > { %p1644_p5 = pneg %p1643_p6 }
  0x73   : > { %p1651_p1 = pnand %p1650_p12, %p1644_p5 }
  0x75   : > { %1654 = shalt.err (!%p1651_p1)
}
  0x76   : > { %1427 = dma.hbm_to_vmem [thread:$0]  (!%p2013_p7), %s2423_s2, 128, %s290_s4, [#allocation9]  }
  0x77   : > { %s1266_s28 = sadd.s32 4294967294, %s1877_s15   ;;  %s44_s18 = sadd.s32 1, %s1873_s14 }
  0x78   : > { %p2479_p12 = scmp.ne.s32.totalorder %s2470_s25, 0  ;;  %s51_s21 = sadd.s32 1, %s1857_s10 }
  0x79   : > { %p58_p0 = scmp.ne.s32.totalorder %s1857_s10, %s1853_s9  ;;  %p64_p4 = scmp.ne.s32.totalorder %s1853_s9, %s1849_s30 }
  0x7a   : > { %s2522_s18 = smov (!%p2479_p12, %s44_s18), %s1873_s14  ;;  %p2480_p10 = scmp.eq.s32.totalorder %s1877_s15, 0 }
  0x7b   : > { %p46_p9 = scmp.ge.s32.totalorder %s2522_s18, 2  ;;  %p224_p11 = scmp.eq.s32.totalorder %s1993_s16, 15 }
  0x7c   : > { %p2154_p3 = por %p2480_p10, %p58_p0  ;;  %p2482_p7 = scmp.eq.s32.totalorder %s1993_s16, 0 }
  0x7d   : > { %s2524_s18 = smov (%p46_p9, %s2522_s18), 0  ;;  %p2167_p2 = por %p224_p11, %p58_p0 }
  0x7e   : > { %p2163_p13 = por %p2482_p7, %p64_p4  ;;  %s48_s27 = ssub.s32 %s1873_s14, %s2524_s18 }
  0x7f   : > { %s2484_s25 = scalar_select %p2167_p2, 1, 0 }
  0x80   : > { %p230_p6 = scmp.eq.s32.totalorder %s1266_s28, 15  ;;  %p49_p5 = scmp.eq.s32.totalorder %s48_s27, 0 }
  0x81   : > { %s306_s1 = sand.u32 1, %s1857_s10   ;;  %s1272_s12 = sshll.u32 %s1873_s14, 6 }
  0x82   : > { %p2174_p8 = por %p230_p6, %p64_p4  ;;  %s1271_s26 = sshll.u32 %s306_s1, 2 }
  0x83   : > { %s2179_s19 = scalar_select %p49_p5, %s1857_s10, %s51_s21  }
  0x84   : > { %s2485_s7 = scalar_select %p2174_p8, 1, 0 }
  0x85   : > { %s2185_s11 = scalar_lea.hbm %s2421_s0, %s1272_s12  ;;  %s310_s17 = scalar_lea.vmem [#allocation5], %s1271_s26 }
  0x86   : > { %s317_s28 = sshll.u32 %s310_s17, 4  ;;  %p2486_p1 = scmp.lt.s32.totalorder %s1877_s15, 16  ;;  %s2198_s28 = int_to_ptr.vmem [resolvable:$true] %s317_s28 }
  0x87   : > { %s307_s21 = scalar_lea.sflag [#allocation6], %s306_s1  ;;  %s1655_s12 = scalar_lea.hbm %s2185_s11, 64 }
  0x88   : > { %p2191_p12 = pnand %p2486_p1, %p2154_p3  ;;  %p1656_p0 = scmp.ne.s32.totalorder %s2185_s11, %s1655_s12 }
  0x89   : > { %s1660_s20 = scalar_lea.hbm %s2421_s0, 128  ;;  %p1661_p3 = scmp.lt.u32.totalorder %s2185_s11, %s2421_s0 }
  0x8a   : > { %p1657_p9 = pneg %p2191_p12  ;;  %p1662_p11 = scmp.lt.u32.totalorder %s1660_s20, %s1655_s12 }
  0x8b   : > { %p1664_p6 = scmp.lt.u32.totalorder %s1655_s12, %s2185_s11 }
  0x8c   : > { %p1658_p4 = pnand %p1657_p9, %p1656_p0  ;;  %p1663_p7 = por %p1662_p11, %p1661_p3 }
  0x8e   : > { %p1659_p10 = pneg %p1658_p4  ;;  %p1665_p5 = por %p1664_p6, %p1663_p7 }
  0x90   : > { %p1666_p1 = pnand %p1665_p5, %p1659_p10 }
  0x92   : > { %1669 = shalt.err (!%p1666_p1)
}
  0x93   : > { %s1670_s1 = scalar_lea.vmem %s2198_s28, 64  ;;  %s1886_s24 = smov [#allocation5]  }
  0x94   : > { %p1671_p0 = scmp.ne.s32.totalorder %s2198_s28, %s1670_s1  ;;  %s1675_s26 = sshll.u32 %s1886_s24, 4  ;;  %s1676_s26 = int_to_ptr.vmem [resolvable:$false] %s1675_s26 }
  0x95   : > { %s1677_s3 = scalar_lea.vmem %s1676_s26, 128  ;;  %p1678_p2 = scmp.lt.s32.totalorder %s2198_s28, %s1676_s26 }
  0x96   : > { %p1673_p4 = pnand %p1671_p0, %p1657_p9  ;;  %p1679_p3 = scmp.lt.s32.totalorder %s1677_s3, %s1670_s1 }
  0x98   : > { %p1674_p8 = pneg %p1673_p4  ;;  %p1680_p11 = por %p1679_p3, %p1678_p2 }
  0x9a   : > { %p1681_p7 = pnand %p1680_p11, %p1674_p8 }
  0x9c   : > { %1684 = shalt.err (!%p1681_p7)
}
  0x9d   : > { %s2488_s12 = sld [smem:[#allocation30_spill]]  ;;  %s1685_s20 = scalar_lea.hbm %s2117_s23, 1024 }
  0x9e   : > { %1431 = dma.hbm_to_vmem [thread:$0]  (!%p2191_p12), %s2185_s11, 64, %s2198_s28, %s307_s21  }
  0x9f   : > { %p1686_p9 = scmp.ne.s32.totalorder %s2117_s23, %s1685_s20  ;;  %s1690_s24 = scalar_lea.hbm %s2426_s5, 8192 }
  0xa0   : > { %p1691_p2 = scmp.lt.u32.totalorder %s2117_s23, %s2426_s5  ;;  %p1692_p8 = scmp.lt.u32.totalorder %s1690_s24, %s1685_s20 }
  0xa1   : > { %p1694_p4 = scmp.lt.u32.totalorder %s1685_s20, %s2117_s23 }
  0xa2   : > { %p1693_p0 = por %p1692_p8, %p1691_p2 }
  0xa3   : > { %p2489_p10 = scmp.ne.s32.totalorder %s2488_s12, 0 }
  0xa4   : > { %p1695_p3 = por %p1694_p4, %p1693_p0 }
  0xa5   : > { %p2490_p6 = pneg %p2489_p10 }
  0xa7   : > { %p1688_p5 = pnand %p1686_p9, %p2490_p6 }
  0xa9   : > { %p1689_p1 = pneg %p1688_p5 }
  0xab   : > { %p1696_p11 = pnand %p1695_p3, %p1689_p1 }
  0xad   : > { %1699 = shalt.err (!%p1696_p11)
}
  0xae   : > { %s1700_s11 = scalar_lea.vmem %s2196_s6, 1024  ;;  %p2491_p7 = pmov %p2490_p6 }
  0xaf   : > { %p1701_p12 = scmp.ne.s32.totalorder %s2196_s6, %s1700_s11  ;;  %s1887_s28 = smov [#allocation13]  }
  0xb0   : > { %s1705_s21 = sshll.u32 %s1887_s28, 4  ;;  %s1706_s21 = int_to_ptr.vmem [resolvable:$false] %s1705_s21 }
  0xb1   : > { %p1703_p9 = pnand %p1701_p12, %p2491_p7  ;;  %s1707_s3 = scalar_lea.vmem %s1706_s21, 2048 }
  0xb2   : > { %p1708_p5 = scmp.lt.s32.totalorder %s2196_s6, %s1706_s21  ;;  %p1709_p2 = scmp.lt.s32.totalorder %s1707_s3, %s1700_s11 }
  0xb3   : > { %p1704_p6 = pneg %p1703_p9 }
  0xb4   : > { %p1710_p8 = por %p1709_p2, %p1708_p5 }
  0xb6   : > { %p1711_p0 = pnand %p1710_p8, %p1704_p6 }
  0xb8   : > { %1714 = shalt.err (!%p1711_p0)
}
  0xb9   : > { %1437 = dma.hbm_to_vmem [thread:$0]  (!%p2489_p10), %s2117_s23, 1024, %s2196_s6, %s2081_s22, %s1883_s29, %s1883_s29, %s1884_s8  }
  0xba   : > { %s2492_s20 = sld [smem:[#allocation27_spill]] }
  0xc0   : > { %p2493_p1 = scmp.ne.s32.totalorder %s2492_s20, 0 }
  0xc1   : > { %s2255_s17 = sand.u32 (!%p2493_p1), 1, %s1853_s9  }
  0xc2   : > { %368 = sbr.rel (%p2493_p1) target bundleno = 1306 (0x51a), region = 48  ;;  %s1280_s1 = sshll.u32 (!%p2493_p1), %s2255_s17, 2 }
  0xc3   : > { %s371_s24 = scalar_lea.sflag (!%p2493_p1), [#allocation6], %s2255_s17  ;;  %s2259_s26 = scalar_lea.vmem (!%p2493_p1), [#allocation5], %s1280_s1 }
  0xc9   : > { %1816 = dma.done.wait (%p2163_p13), %s371_s24, 64  }
  0xca   : > { %1818 = vsyncadd (%p2163_p13), %s371_s24, 4294967232  ;;  %p2494_p10 = scmp.eq.s32.totalorder %s1993_s16, 0 }
  0xcc   : > { %1820 = dma.done.wait (%p2494_p10), [#allocation9], 2176   ;;  %p2495_p4 = pmov %p2494_p10 }
  0xcd   : > { %s2496_s22 = sld [smem:[#allocation22_spill]]  ;;  %s2497_s29 = sld [smem:[#allocation26_spill]] }
  0xce   : > { %1822 = vsyncadd (%p2495_p4), [#allocation9], 4294965120  ;;  %s387_s8 = sand.u32 1, %s1993_s16  }
  0xcf   : > { %s388_s12 = scalar_lea.sflag [#allocation12], %s387_s8 }
  0xd3   : > { %s389_s23 = sand.u32 1, %s2496_s22   ;;  %p2498_p3 = scmp.ne.s32.totalorder %s2497_s29, 0 }
  0xd4   : > { %s1283_s6 = sshll.u32 %s389_s23, 6 }
  0xd5   : > { %s2271_s27 = scalar_lea.vmem [#allocation11], %s1283_s6 }
  0xd6   : > { %1824 = dma.done.wait (%p2498_p3), %s388_s12, 2048  }
  0xd7   : > { %1826 = vsyncadd (%p2498_p3), %s388_s12, 4294965248  ;;  %s1285_s4 = sshll.u32 %s2255_s17, 3  ;;  %s2278_s11 = scalar_lea.vmem [#allocation13], %s1283_s6 }
  0xd8   : > { %s2280_s28 = scalar_lea.vmem [#allocation14], %s1285_s4  ;;  %s2282_s21 = scalar_lea.vmem [#allocation15], %s1280_s1 }
  0xd9   : > { %s2499_s3 = sld [smem:[#allocation24_spill]] }
  0xdf   : > { %p1287_p13 = scmp.ne.s32.totalorder %s2499_s3, 0 }
  0xe0   : > { %v454_v0 = vld [vmem:[#allocation8] sm:$0xff] (!%p1287_p13)  ;;  %v455_v2 = vld [vmem:[#allocation8 + $0x8] sm:$0xff] (!%p1287_p13)  ;;  %v1888_v8 = vmov (!%p1287_p13), 0   ;;  %v456_v15 = vld [vmem:[#allocation8 + $0x10] sm:$0xff] (!%p1287_p13)  ;;  %vm592_vm0 = vcmask (!%p1287_p13), 261120   ;;  %v1889_v34 = vmov (!%p1287_p13), 0.0   ;;  %v472_v35 = vlaneseq (!%p1287_p13) }
  0xe1   : > { %452 = sbr.rel (%p1287_p13) target bundleno = 462 (0x1ce), region = 72  ;;  %v458_v1 = vld [vmem:[#allocation8 + $0x20] sm:$0xff] (!%p1287_p13)  ;;  %v459_v4 = vld [vmem:[#allocation8 + $0x28] sm:$0xff] (!%p1287_p13)  ;;  %628 = vmatprep.mubr.bf16.mxu0 (!%p1287_p13), %v1888_v8  ;;  %669 = vmatprep.mubr.bf16.mxu1 (!%p1287_p13), %v1888_v8  ;;  %v460_v16 = vld [vmem:[#allocation8 + $0x30] sm:$0xff] (!%p1287_p13)  ;;  %796 = vst [vmem:[#allocation3] sm:$0xff] (!%p1287_p13), %v1889_v34 }
  0xe2   : > { %v1289_v3 = vcombine.high (!%p1287_p13), %v454_v0, %v458_v1  ;;  %v1288_v5 = vcombine.low (!%p1287_p13), %v454_v0, %v458_v1  ;;  %v462_v6 = vld [vmem:[#allocation8 + $0x40] sm:$0xff] (!%p1287_p13)  ;;  %v1291_v9 = vcombine.high (!%p1287_p13), %v455_v2, %v459_v4  ;;  %v1290_v10 = vcombine.low (!%p1287_p13), %v455_v2, %v459_v4  ;;  %v463_v12 = vld [vmem:[#allocation8 + $0x48] sm:$0xff] (!%p1287_p13)  ;;  %v457_v17 = vld [vmem:[#allocation8 + $0x18] sm:$0xff] (!%p1287_p13)  ;;  %797 = vst [vmem:[#allocation4] sm:$0xff] (!%p1287_p13), %v1889_v34 }
  0xe3   : > { %v466_v7 = vld [vmem:[#allocation8 + $0x60] sm:$0xff] (!%p1287_p13)  ;;  %v467_v13 = vld [vmem:[#allocation8 + $0x68] sm:$0xff] (!%p1287_p13)  ;;  %v461_v19 = vld [vmem:[#allocation8 + $0x38] sm:$0xff] (!%p1287_p13)  ;;  %v1293_v21 = vcombine.high (!%p1287_p13), %v456_v15, %v460_v16  ;;  %v1292_v28 = vcombine.low (!%p1287_p13), %v456_v15, %v460_v16  ;;  %v473_v36 = vshrl.u32 (!%p1287_p13), %v472_v35, 7 }
  0xe4   : > { %v1297_v11 = vcombine.high (!%p1287_p13), %v462_v6, %v466_v7  ;;  %596 = vmatprep.subr.bf16.mxu0 (!%p1287_p13), %v1289_v3  ;;  %v1299_v14 = vcombine.high (!%p1287_p13), %v463_v12, %v467_v13  ;;  %637 = vmatprep.subr.bf16.mxu1 (!%p1287_p13), %v1291_v9  ;;  %v1296_v18 = vcombine.low (!%p1287_p13), %v462_v6, %v466_v7  ;;  %v464_v23 = vld [vmem:[#allocation8 + $0x50] sm:$0xff] (!%p1287_p13)  ;;  %v465_v25 = vld [vmem:[#allocation8 + $0x58] sm:$0xff] (!%p1287_p13)  ;;  %v470_v38 = vld [vmem:[#allocation10] sm:$0xff] (!%p1287_p13) }
  0xe5   : > { %597 = vmatpush1.bf16.msra.mxu0 (!%p1287_p13), %v1288_v5  ;;  %638 = vmatpush1.bf16.msra.mxu1 (!%p1287_p13), %v1290_v10  ;;  %v1298_v20 = vcombine.low (!%p1287_p13), %v463_v12, %v467_v13  ;;  %v1295_v22 = vcombine.high (!%p1287_p13), %v457_v17, %v461_v19  ;;  %v468_v24 = vld [vmem:[#allocation8 + $0x70] sm:$0xff] (!%p1287_p13)  ;;  %v469_v26 = vld [vmem:[#allocation8 + $0x78] sm:$0xff] (!%p1287_p13)  ;;  %v1294_v29 = vcombine.low (!%p1287_p13), %v457_v17, %v461_v19  ;;  %v474_v37 = vsub.s32 (!%p1287_p13), 0, %v473_v36 }
  0xe6   : > { %598 = vmatprep.subr.bf16.mxu0 (!%p1287_p13), %v1297_v11  ;;  %639 = vmatprep.subr.bf16.mxu1 (!%p1287_p13), %v1299_v14  ;;  %v453_v27 = vld [vmem:[%s2259_s26] sm:$0xf] (!%p1287_p13)  ;;  %v1301_v30 = vcombine.high (!%p1287_p13), %v464_v23, %v468_v24  ;;  %v1303_v31 = vcombine.high (!%p1287_p13), %v465_v25, %v469_v26  ;;  %v1300_v32 = vcombine.low (!%p1287_p13), %v464_v23, %v468_v24  ;;  %v482_v39 = vsub.s32 (!%p1287_p13), 2, %v473_v36 }
  0xe7   : > { %v1302_v33 = vcombine.low (!%p1287_p13), %v465_v25, %v469_v26  ;;  %v478_v40 = vsub.s32 (!%p1287_p13), 1, %v473_v36  ;;  %v486_v41 = vsub.s32 (!%p1287_p13), 3, %v473_v36  ;;  %v475_v42 = vrot.slane (!%p1287_p13), %v470_v38, %v474_v37 }
  0xe8   : > { %v483_v43 = vrot.slane %v470_v38, %v482_v39  ;;  %v490_v50 = vsub.s32 4, %v473_v36  ;;  %v498_v55 = vsub.s32 6, %v473_v36  ;;  %v494_v56 = vsub.s32 5, %v473_v36 }
  0xe9   : > { %599 = vmatpush1.bf16.msra.mxu0 %v1296_v18  ;;  %640 = vmatpush1.bf16.msra.mxu1 %v1298_v20  ;;  %v479_v44 = vrot.slane %v470_v38, %v478_v40  ;;  %v487_v45 = vrot.slane %v470_v38, %v486_v41  ;;  %v502_v60 = vsub.s32 7, %v473_v36 }
  0xea   : > { %678 = vmatprep.subr.bf16.mxu0 %v1293_v21  ;;  %719 = vmatprep.subr.bf16.mxu1 %v1295_v22  ;;  %v491_v0 = vrot.slane %v470_v38, %v490_v50  ;;  %v499_v1 = vrot.slane %v470_v38, %v498_v55  ;;  %v495_v2 = vrot.slane %v470_v38, %v494_v56 }
  0xeb   : > { %v503_v3 = vrot.slane %v470_v38, %v502_v60 }
  0xec   : > { %1304 = vmatmul.mubr.msk.bf16.vlgmr.msra.gmra.mrb[0].mxu0 %vm592_vm0, %v453_v27  ;;  %1305 = vmatmul.mubr.msk.bf16.vlgmr.msra.gmra.mrb[0].mxu1 %vm592_vm0, %v453_v27 }
  0xed   : > { %679 = vmatpush1.bf16.msra.mxu0 %v1292_v28  ;;  %720 = vmatpush1.bf16.msra.mxu1 %v1294_v29 }
  0xee   : > { %680 = vmatprep.subr.bf16.mxu0 %v1301_v30  ;;  %721 = vmatprep.subr.bf16.mxu1 %v1303_v31 }
  0xef   : > { %710 = vmatprep.mubr.bf16.mxu0 %v1888_v8  ;;  %751 = vmatprep.mubr.bf16.mxu1 %v1888_v8 }
  0xf1   : > { %681 = vmatpush1.bf16.msra.mxu0 %v1300_v32  ;;  %722 = vmatpush1.bf16.msra.mxu1 %v1302_v33 }
  0xf4   : > { %1306 = vmatmul.mubr.msk.bf16.vlgmr.msra.gmra.mrb[4].mxu0 %vm592_vm0, %v453_v27  ;;  %1307 = vmatmul.mubr.msk.bf16.vlgmr.msra.gmra.mrb[4].mxu1 %vm592_vm0, %v453_v27 }
 0x1bf   : > { %v630_v46 = vpop.f32.mrb[0].mxu0  ;;  %v671_v48 = vpop.f32.mrb[0].mxu1 }
 0x1c0   : > { %v631_v47 = vadd.f32 %v630_v46, %v475_v42  ;;  %v632_v49 = vpop.f32.mrb[1].mxu0  ;;  %v672_v51 = vadd.f32 %v671_v48, %v483_v43  ;;  %v673_v53 = vpop.f32.mrb[1].mxu1 }
 0x1c1   : > { %v633_v52 = vadd.f32 %v632_v49, %v479_v44  ;;  %v634_v54 = vpop.f32.mrb[2].mxu0  ;;  %v674_v57 = vadd.f32 %v673_v53, %v487_v45  ;;  %v675_v58 = vpop.f32.mrb[2].mxu1 }
 0x1c2   : > { %v635_v59 = vpop.f32.mrb[3].mxu0  ;;  %v676_v62 = vpop.f32.mrb[3].mxu1 }
 0x1c3   : > { %v1341_v61 = vpack.c.bf16 %v633_v52, %v631_v47  ;;  %v1342_v63 = vpack.c.bf16 %v674_v57, %v672_v51 }
 0x1c5   : > { %792 = vst [vmem:[#allocation2] sm:$0xff] %v1341_v61  ;;  %793 = vst [vmem:[#allocation2 + $0x8] sm:$0xff] %v1342_v63 }
 0x1c7   : > { %v712_v4 = vpop.f32.mrb[4].mxu0  ;;  %v753_v6 = vpop.f32.mrb[4].mxu1 }
 0x1c8   : > { %v713_v5 = vadd.f32 %v712_v4, %v491_v0  ;;  %v714_v7 = vpop.f32.mrb[5].mxu0  ;;  %v754_v8 = vadd.f32 %v753_v6, %v499_v1  ;;  %v755_v10 = vpop.f32.mrb[5].mxu1 }
 0x1c9   : > { %v715_v9 = vadd.f32 %v714_v7, %v495_v2  ;;  %v716_v11 = vpop.f32.mrb[6].mxu0  ;;  %v756_v12 = vadd.f32 %v755_v10, %v503_v3  ;;  %v757_v13 = vpop.f32.mrb[6].mxu1 }
 0x1ca   : > { %v717_v14 = vpop.f32.mrb[7].mxu0  ;;  %v758_v16 = vpop.f32.mrb[7].mxu1 }
 0x1cb   : > { %v1343_v15 = vpack.c.bf16 %v715_v9, %v713_v5  ;;  %v1344_v17 = vpack.c.bf16 %v756_v12, %v754_v8 }
 0x1cd   : > { %794 = vst [vmem:[#allocation2 + $0x10] sm:$0xff] %v1343_v15  ;;  %795 = vst [vmem:[#allocation2 + $0x18] sm:$0xff] %v1344_v17 }
 0x1ce PF: > { %v1549_v18 = vld [vmem:[%s2271_s27] sm:$0xff]   ;;  %v1890_v19 = vmov 0.0   ;;  %v1550_v20 = vld [vmem:[%s2271_s27 + $0x8] sm:$0xff]   ;;  %s2500_s16 = sld [smem:[#allocation24_spill]]  ;;  %vm1891_vm1 = vmmov 0   ;;  %v1551_v21 = vld [vmem:[%s2271_s27 + $0x10] sm:$0xff]  }
 0x1cf   : > { %1363 = vmatprep.subr.bf16.mxu0 %v1890_v19  ;;  %1383 = vmatprep.subr.bf16.mxu1 %v1890_v19  ;;  %v1552_v22 = vld [vmem:[%s2271_s27 + $0x18] sm:$0xff]   ;;  %v1553_v23 = vld [vmem:[%s2271_s27 + $0x20] sm:$0xff]   ;;  %v1554_v24 = vld [vmem:[%s2271_s27 + $0x28] sm:$0xff]   ;;  %s2501_s8 = sld [smem:[#allocation33_spill]] }
 0x1d0   : > { %1364 = vmatpush3.bf16.msra.mxu0 %v1549_v18  ;;  %1379 = vmatprep.mubr.msk.bf16.mxu0 %vm1891_vm1, %v1890_v19  ;;  %v1555_v25 = vld [vmem:[%s2271_s27 + $0x30] sm:$0xff]   ;;  %v1556_v26 = vld [vmem:[%s2271_s27 + $0x38] sm:$0xff]   ;;  %v1557_v34 = vld [vmem:[%s2278_s11] sm:$0xff]  }
 0x1d1   : > { %1365 = vmatprep.subr.bf16.mxu0 %v1890_v19  ;;  %1399 = vmatprep.mubr.msk.bf16.mxu1 %vm1891_vm1, %v1890_v19  ;;  %v1558_v35 = vld [vmem:[%s2278_s11 + $0x8] sm:$0xff]   ;;  %v1559_v36 = vld [vmem:[%s2278_s11 + $0x10] sm:$0xff]   ;;  %v1560_v41 = vld [vmem:[%s2278_s11 + $0x18] sm:$0xff]  }
 0x1d2   : > { %1384 = vmatpush3.bf16.msra.mxu1 %v1557_v34  ;;  %v1561_v42 = vld [vmem:[%s2278_s11 + $0x20] sm:$0xff]   ;;  %v1562_v43 = vld [vmem:[%s2278_s11 + $0x28] sm:$0xff]   ;;  %v1563_v44 = vld [vmem:[%s2278_s11 + $0x30] sm:$0xff]  }
 0x1d3   : > { %1385 = vmatprep.subr.bf16.mxu1 %v1890_v19  ;;  %v1564_v45 = vld [vmem:[%s2278_s11 + $0x38] sm:$0xff]   ;;  %v927_v51 = vld [vmem:[#allocation4] sm:$0xff]  ;;  %v930_v55 = vld [vmem:[#allocation3] sm:$0xff] }
 0x1d4   : > { %1366 = vmatpush3.bf16.msra.mxu0 %v1550_v20  ;;  %s1312_s20 = sshll.u32 %s2500_s16, 7  ;;  %p1331_p11 = scmp.ne.s32.totalorder %s2500_s16, 7 }
 0x1d5   : > { %1367 = vmatprep.subr.bf16.mxu0 %v1890_v19  ;;  %s799_s1 = sshra.s32 %s1312_s20, 7  ;;  %v1314_v28 = vld [vmem:[%s2501_s8] ss:$0 sm:$0xff]  ;;  %s2502_s12 = sld [smem:[#allocation34_spill]] (!%p1331_p11) }
 0x1d6   : > { %s1313_s24 = sshll.u32 %s799_s1, 2  ;;  %1386 = vmatpush3.bf16.msra.mxu1 %v1558_v35 }
 0x1d7   : > { %s802_s26 = scalar_lea.vmem [#allocation2], %s1313_s24  ;;  %1387 = vmatprep.subr.bf16.mxu1 %v1890_v19 }
 0x1d8   : > { %1368 = vmatpush3.bf16.msra.mxu0 %v1551_v21  ;;  %v803_v27 = vld [vmem:[%s802_s26] sm:$0xf] }
 0x1d9   : > { %1369 = vmatprep.subr.bf16.mxu0 %v1890_v19 }
 0x1da   : > { %1388 = vmatpush3.bf16.msra.mxu1 %v1559_v36 }
 0x1db   : > { %1389 = vmatprep.subr.bf16.mxu1 %v1890_v19  ;;  %v1332_v62 = vld [vmem:[%s2502_s12] ss:$0 sm:$0xff] (!%p1331_p11) }
 0x1dc   : > { %1370 = vmatpush3.bf16.msra.mxu0 %v1552_v22 }
 0x1dd   : > { %1371 = vmatprep.subr.bf16.mxu0 %v1890_v19 }
 0x1de   : > { %1390 = vmatpush3.bf16.msra.mxu1 %v1560_v41 }
 0x1df   : > { %1391 = vmatprep.subr.bf16.mxu1 %v1890_v19 }
 0x1e0   : > { %1372 = vmatpush3.bf16.msra.mxu0 %v1553_v23 }
 0x1e1   : > { %1373 = vmatprep.subr.bf16.mxu0 %v1890_v19 }
 0x1e2   : > { %1392 = vmatpush3.bf16.msra.mxu1 %v1561_v42 }
 0x1e3   : > { %1393 = vmatprep.subr.bf16.mxu1 %v1890_v19 }
 0x1e4   : > { %1374 = vmatpush3.bf16.msra.mxu0 %v1554_v24 }
 0x1e5   : > { %1375 = vmatprep.subr.bf16.mxu0 %v1890_v19 }
 0x1e6   : > { %1394 = vmatpush3.bf16.msra.mxu1 %v1562_v43 }
 0x1e7   : > { %1395 = vmatprep.subr.bf16.mxu1 %v1890_v19 }
 0x1e8   : > { %1376 = vmatpush3.bf16.msra.mxu0 %v1555_v25 }
 0x1e9   : > { %1377 = vmatprep.subr.bf16.mxu0 %v1890_v19 }
 0x1ea   : > { %1396 = vmatpush3.bf16.msra.mxu1 %v1563_v44 }
 0x1eb   : > { %1397 = vmatprep.subr.bf16.mxu1 %v1890_v19 }
 0x1ec   : > { %1378 = vmatpush3.bf16.msra.mxu0 %v1556_v26 }
 0x1ee   : > { %1398 = vmatpush3.bf16.msra.mxu1 %v1564_v45 }
 0x1ef   : > { %1380 = vmatmul.mubr.bf16.vlgmr.msra.gmra.mrb[0].mxu0 %v803_v27 }
 0x2c2   : > { %v909_v29 = vpop.f32.mrb[0].mxu0 }
 0x2c3   : > { %v910_v30 = vadd.f32 %v1314_v28, %v909_v29  ;;  %v1381_v31 = vpop.f32.mrb[1].mxu0 }
 0x2c4   : > { %v912_v32 = vpop.f32.mrb[2].mxu0 }
 0x2c5   : > { %915 = vmax.xlane.f32.xlu0 %v910_v30  ;;  %v1382_v33 = vpop.f32.mrb[3].mxu0 }
 0x352   : > { %v916_v37 = vpop.xlane.xlu0 %915 }
 0x353   : > { %v917_v38 = vsub.f32 %v910_v30, %v916_v37 }
 0x355   : > { %v918_v39 = vmul.f32 1.442695, %v917_v38 }
 0x357   : > { %1565 = vpow2.f32 %v918_v39 }
 0x361   : > { %v1566_v40 = vpop.eup %1565 }
 0x362   : > { %920 = vadd.xlane.f32.xlu0 %v1566_v40 }
 0x3ef   : > { %v921_v46 = vpop.xlane.xlu0 %920 }
 0x3f0   : > { %1567 = vrcp.f32 %v921_v46 }
 0x3fa   : > { %v1568_v47 = vpop.eup %1567 }
 0x3fb   : > { %v923_v48 = vmul.f32 %v1568_v47, %v921_v46 }
 0x3fd   : > { %v924_v49 = vsub.f32 2.0, %v923_v48 }
 0x3ff   : > { %v925_v50 = vmul.f32 %v1568_v47, %v924_v49 }
 0x401   : > { %v926_v52 = vmul.f32 %v1566_v40, %v925_v50 }
 0x403   : > { %v928_v53 = vadd.f32 %v927_v51, %v926_v52  ;;  %v931_v54 = vpack.c.bf16 %v926_v52, %v926_v52 }
 0x405   : > { %929 = vst [vmem:[#allocation4] sm:$0xff] %v928_v53  ;;  %1400 = vmatmul.mubr.bf16.vlgmr.msra.gmra.mrb[0].mxu1 %v931_v54 }
 0x40c   : > { %v1052_v63 = vld [vmem:[#allocation4] sm:$0xff] (!%p1331_p11) }
 0x40d   : > { %v1053_v1 = vmul.f32 (!%p1331_p11), 0.125, %v1052_v63 }
 0x40f   : > { %v1054_v2 = vpack.c.bf16 (!%p1331_p11), %v1053_v1, %v1053_v1 }
 0x411   : > { %1055 = vst [vmem:[%s2282_s21] sm:$0xf] (!%p1331_p11), %v1054_v2 }
 0x4d5   : > { %1041 = sbr.rel (%p1331_p11) target bundleno = 1254 (0x4e6), region = 76 }
 0x4d8   : > { %v1030_v56 = vpop.f32.mrb[0].mxu1 }
 0x4d9   : > { %v1036_v57 = vadd.f32 %v1030_v56, %v930_v55  ;;  %v1401_v58 = vpop.f32.mrb[1].mxu1 }
 0x4da   : > { %v1033_v59 = vpop.f32.mrb[2].mxu1 }
 0x4db   : > { %1037 = vst [vmem:[#allocation3] sm:$0xff] %v1036_v57  ;;  %v1402_v60 = vpop.f32.mrb[3].mxu1 }
 0x4e2   : > { %v1042_v61 = vld [vmem:[#allocation3] sm:$0xff] }
 0x4e3   : > { %v1050_v0 = vadd.f32 %v1332_v62, %v1042_v61 }
 0x4e5   : > { %1051 = vst [vmem:[%s2280_s28] sm:$0xff] %v1050_v0 }
 0x4e6 PF: > { %s2503_s27 = sld [smem:[#allocation25_spill]]  ;;  %s2504_s16 = sld [smem:[#allocation35_spill]] }
 0x4e7   : > { %s1075_s1 = sshll.u32 %s2280_s28, 4  ;;  %s1057_s24 = scalar_lea.sflag [#allocation7], %s2255_s17  ;;  %s1076_s1 = int_to_ptr.vmem [resolvable:$true] %s1075_s1 }
 0x4e8   : > { %s1715_s26 = scalar_lea.vmem %s1076_s1, 128  ;;  %p2505_p7 = scmp.ne.s32.totalorder %s2484_s25, 0 }
 0x4e9   : > { %p1716_p12 = scmp.ne.s32.totalorder %s1076_s1, %s1715_s26  ;;  %s1892_s22 = smov [#allocation14]  }
 0x4ea   : > { %s1719_s29 = sshll.u32 %s1892_s22, 4  ;;  %s1720_s29 = int_to_ptr.vmem [resolvable:$false] %s1719_s29 }
 0x4eb   : > { %p1717_p9 = pnand %p1716_p12, %p2505_p7  ;;  %s1721_s8 = scalar_lea.vmem %s1720_s29, 256 }
 0x4ec   : > { %s1335_s4 = sshll.u32 %s2503_s27, 7  ;;  %p1722_p5 = scmp.lt.s32.totalorder %s1076_s1, %s1720_s29 }
 0x4ed   : > { %s2338_s20 = scalar_lea.hbm %s2504_s16, %s1335_s4  ;;  %p1718_p6 = pneg %p1717_p9 }
 0x4ee   : > { %p1723_p2 = scmp.lt.s32.totalorder %s1721_s8, %s1715_s26 }
 0x4f0   : > { %p1724_p8 = por %p1723_p2, %p1722_p5 }
 0x4f2   : > { %p1725_p0 = pnand %p1724_p8, %p1718_p6 }
 0x4f4   : > { %1728 = shalt.err (!%p1725_p0)
}
 0x4f5   : > { %s1729_s28 = scalar_lea.hbm %s2338_s20, 128  ;;  %s1733_s12 = scalar_lea.hbm %s2504_s16, 256 }
 0x4f6   : > { %p1730_p1 = scmp.ne.s32.totalorder %s2338_s20, %s1729_s28  ;;  %p1734_p3 = scmp.lt.u32.totalorder %s2338_s20, %s2504_s16 }
 0x4f7   : > { %p1735_p13 = scmp.lt.u32.totalorder %s1733_s12, %s1729_s28  ;;  %p1737_p12 = scmp.lt.u32.totalorder %s1729_s28, %s2338_s20 }
 0x4f8   : > { %p1731_p10 = pnand %p1730_p1, %p2505_p7 }
 0x4f9   : > { %p1736_p11 = por %p1735_p13, %p1734_p3 }
 0x4fa   : > { %p1732_p4 = pneg %p1731_p10 }
 0x4fb   : > { %p1738_p9 = por %p1737_p12, %p1736_p11 }
 0x4fd   : > { %p1739_p6 = pnand %p1738_p9, %p1732_p4 }
 0x4ff   : > { %1742 = shalt.err (!%p1739_p6)
}
 0x500   : > { %1417 = dma.vmem_to_hbm [thread:$0]  (%p2505_p7), %s1076_s1, 128, %s2338_s20, %s1057_s24  }
 0x501   : > { %s1336_s3 = sshll.u32 %s2503_s27, 6  ;;  %s1088_s26 = sshll.u32 %s2282_s21, 4  ;;  %s1089_s26 = int_to_ptr.vmem [resolvable:$true] %s1088_s26 }
 0x502   : > { %s2506_s8 = sld [smem:[#allocation36_spill]]  ;;  %s1062_s28 = scalar_lea.sflag [#allocation16], %s2255_s17 }
 0x503   : > { %s1743_s6 = scalar_lea.vmem %s1089_s26, 64  ;;  %s1893_s12 = smov [#allocation15]  }
 0x504   : > { %p1744_p5 = scmp.ne.s32.totalorder %s1089_s26, %s1743_s6  ;;  %s1747_s4 = sshll.u32 %s1893_s12, 4  ;;  %s1748_s4 = int_to_ptr.vmem [resolvable:$false] %s1747_s4 }
 0x505   : > { %s1749_s11 = scalar_lea.vmem %s1748_s4, 128  ;;  %p1750_p0 = scmp.lt.s32.totalorder %s1089_s26, %s1748_s4 }
 0x506   : > { %p1745_p2 = pnand %p1744_p5, %p2505_p7  ;;  %p1751_p1 = scmp.lt.s32.totalorder %s1749_s11, %s1743_s6 }
 0x508   : > { %s2364_s23 = scalar_lea.hbm %s2506_s8, %s1336_s3  ;;  %p1746_p8 = pneg %p1745_p2 }
 0x509   : > { %p1752_p10 = por %p1751_p1, %p1750_p0 }
 0x50b   : > { %p1753_p4 = pnand %p1752_p10, %p1746_p8 }
 0x50d   : > { %1756 = shalt.err (!%p1753_p4)
}
 0x50e   : > { %s1757_s17 = scalar_lea.hbm %s2364_s23, 64  ;;  %s1761_s20 = scalar_lea.hbm %s2506_s8, 128 }
 0x50f   : > { %p1758_p3 = scmp.ne.s32.totalorder %s2364_s23, %s1757_s17  ;;  %p1762_p12 = scmp.lt.u32.totalorder %s2364_s23, %s2506_s8 }
 0x510   : > { %p1763_p9 = scmp.lt.u32.totalorder %s1761_s20, %s1757_s17  ;;  %p1765_p5 = scmp.lt.u32.totalorder %s1757_s17, %s2364_s23 }
 0x511   : > { %p1759_p13 = pnand %p1758_p3, %p2505_p7 }
 0x512   : > { %p1764_p6 = por %p1763_p9, %p1762_p12 }
 0x513   : > { %p1760_p11 = pneg %p1759_p13 }
 0x514   : > { %p1766_p2 = por %p1765_p5, %p1764_p6 }
 0x516   : > { %p1767_p8 = pnand %p1766_p2, %p1760_p11 }
 0x518   : > { %1770 = shalt.err (!%p1767_p8)
}
 0x519   : > { %1418 = dma.vmem_to_hbm [thread:$0]  (%p2505_p7), %s1089_s26, 64, %s2364_s23, %s1062_s28  }
 0x51a PF: > { %p1450_p0 = scmp.ge.s32.totalorder %s1877_s15, 2  ;;  %s1100_s3 = sand.u32 1, %s1849_s30  }
 0x51b   : > { %p2507_p1 = scmp.ne.s32.totalorder %s2485_s7, 0  ;;  %s1101_s22 = scalar_lea.sflag [#allocation7], %s1100_s3 }
 0x51d   : > { %p1439_p10 = pnand %p1450_p0, %p2507_p1 }
 0x51f   : > { %1828 = dma.done.wait (!%p1439_p10), %s1101_s22, 128  }
 0x520   : > { %1830 = vsyncadd (!%p1439_p10), %s1101_s22, 4294967168  ;;  %s1110_s29 = scalar_lea.sflag [#allocation16], %s1100_s3 }
 0x521   : > { %1832 = dma.done.wait (!%p1439_p10), %s1110_s29, 64  }
 0x522   : > { %1834 = vsyncadd (!%p1439_p10), %s1110_s29, 4294967232  ;;  %s32_s15 = sadd.s32 1, %s1877_s15   ;;  %s2508_s27 = sld [smem:[#allocation22_spill]] }
 0x523   : > { %p29_p4 = scmp.ge.s32.totalorder %s32_s15, 18   ;;  %s2509_s28 = sld [smem:[#allocation23_spill]] }
 0x524   : > { %s2510_s29 = sld [smem:[#allocation29_spill]]  ;;  %s2511_s25 = sld [smem:[#allocation28_spill]] }
 0x525   : > { %s2512_s30 = smov %s1853_s9  ;;  %s2513_s9 = smov %s1857_s10 }
 0x526   : > { %s2514_s10 = smov %s2179_s19  ;;  %s2515_s11 = smov %s1869_s13 }
 0x527   : > { %s2516_s12 = smov %s1873_s14  ;;  %s2518_s14 = smov %s2524_s18 }
 0x528   :  { %31 = sbr.rel (!%p29_p4) target bundleno = 21 (0x15), region = 151 }
 0x52a   : > { %s2517_s13 = smov %s2511_s25 }
 0x52f   :  { %1115 = vsyncpa [#allocation6], 1 }
 0x530   :  { %1117 = vsyncpa [#allocation6 + $0x1], 1 }
 0x531   :  { %1118 = vsyncpa [#allocation9], 1 }
 0x532   :  { %1119 = vsyncpa [#allocation12], 1 }
 0x533   :  { %1121 = vsyncpa [#allocation12 + $0x1], 1 }
 0x534   :  { %1122 = vsyncpa [#allocation7], 1 }
 0x535   :  { %1124 = vsyncpa [#allocation7 + $0x1], 1 }
 0x536   :  { %1125 = vsyncpa [#allocation16], 1 }
 0x537   :  { %1127 = vsyncpa [#allocation16 + $0x1], 1 }

</bundles_post_ra>
